<compile_context>
chip_gen: v7x
topology: tpu7x:2x2x1
jax: 0.10.0
libtpu: 0.0.40
codegen_flags: <defaults>
</compile_context>

<pallas_src>
import functools
import math

import jax
import jax.numpy as jnp
from jax import lax
from jax.experimental import pallas as pl
from jax.experimental.pallas import tpu as pltpu


# ----------------------------- in-kernel helpers ----------------------------

def _layernorm(x, gamma, beta, eps):
    # PyTorch nn.LayerNorm: biased variance over the last dim, f32 math.
    mu = jnp.mean(x, axis=-1, keepdims=True)
    var = jnp.mean((x - mu) ** 2, axis=-1, keepdims=True)
    return (x - mu) * lax.rsqrt(var + eps) * gamma + beta


def _linear(x_bf16, w_bf16, b_f32):
    # x: (R, in) bf16, w: (out, in) bf16, b: (1, out) f32  ->  (R, out) f32  [x @ w.T + b]
    return lax.dot_general(x_bf16, w_bf16, (((1,), (1,)), ((), ())),
                           preferred_element_type=jnp.float32) + b_f32


# ------------------------------ Pallas kernels -------------------------------

def fused_blocks_kernel(x_ref,
                        wq_ref, wk_ref, wv_ref, bq_ref, bk_ref, bv_ref,
                        wo_ref, bo_ref, g1_ref, be1_ref,
                        w1_ref, bm1_ref, w2_ref, bm2_ref, g2_ref, be2_ref,
                        out_ref, *, num_heads, eps):
    l = pl.program_id(1)                       # layer index ("arbitrary" axis)
    bt, S, H = x_ref.shape
    hd = H // num_heads
    R = bt * S

    # Residual stream lives in the (revisited) output block across the layer axis.
    @pl.when(l == 0)
    def _():
        out_ref[...] = x_ref[...]

    x = out_ref[...].reshape(R, H)             # (R, H) f32

    # ---- multi-head masked self-attention (all heads batched) ----
    xb = x.astype(jnp.bfloat16)
    q = _linear(xb, wq_ref[0], bq_ref[0])      # (R, H) f32
    k = _linear(xb, wk_ref[0], bk_ref[0])
    v = _linear(xb, wv_ref[0], bv_ref[0])

    def split_heads(t):                        # (R, H) -> (bt*nh, S, hd)
        t = t.reshape(bt, S, num_heads, hd).transpose(0, 2, 1, 3)
        return t.reshape(bt * num_heads, S, hd)

    qh = split_heads(q).astype(jnp.bfloat16)
    kh = split_heads(k).astype(jnp.bfloat16)
    vh = split_heads(v).astype(jnp.bfloat16)

    scores = jnp.einsum("bqd,bkd->bqk", qh, kh,
                        preferred_element_type=jnp.float32) / math.sqrt(hd)
    qi = lax.broadcasted_iota(jnp.int32, (S, S), 0)
    ki = lax.broadcasted_iota(jnp.int32, (S, S), 1)
    scores = jnp.where((ki <= qi)[None, :, :], scores, -1e9)
    scores = scores - jnp.max(scores, axis=-1, keepdims=True)
    p = jnp.exp(scores)
    p = p / jnp.sum(p, axis=-1, keepdims=True)

    oh = jnp.einsum("bqk,bkd->bqd", p.astype(jnp.bfloat16), vh,
                    preferred_element_type=jnp.float32)          # (bt*nh, S, hd)
    attn = oh.reshape(bt, num_heads, S, hd).transpose(0, 2, 1, 3).reshape(R, H)
    y = _linear(attn.astype(jnp.bfloat16), wo_ref[0], bo_ref[0])

    # ---- x = x + LN1(attn(x)) ----
    x = x + _layernorm(y, g1_ref[0], be1_ref[0], eps)

    # ---- MLP: linear -> GELU(exact) -> linear ; x = x + LN2(mlp(x)) ----
    h = _linear(x.astype(jnp.bfloat16), w1_ref[0], bm1_ref[0])
    h = 0.5 * h * (1.0 + lax.erf(h / math.sqrt(2.0)))
    z = _linear(h.astype(jnp.bfloat16), w2_ref[0], bm2_ref[0])
    x = x + _layernorm(z, g2_ref[0], be2_ref[0], eps)

    out_ref[...] = x.reshape(bt, S, H).astype(out_ref.dtype)


def final_kernel(x_ref, g_ref, b_ref, we_ref, out_ref, *, eps):
    # final LayerNorm + unembedding:  logits = LN(x) @ W_E^T
    bt, S, H = x_ref.shape
    V = out_ref.shape[-1]
    x = _layernorm(x_ref[...].reshape(bt * S, H), g_ref[...], b_ref[...], eps)
    logits = lax.dot_general(x.astype(jnp.bfloat16), we_ref[...],
                             (((1,), (1,)), ((), ())),
                             preferred_element_type=jnp.float32)
    out_ref[...] = logits.reshape(bt, S, V).astype(out_ref.dtype)


# ------------------------------ wrappers -------------------------------------

_BLOCK_WEIGHT_NAMES = ["wq", "wk", "wv", "bq", "bk", "bv", "wo", "bo",
                       "g1", "be1", "w1", "bm1", "w2", "bm2", "g2", "be2"]


def run_blocks(x, params, cfg, batch_tile=None):
    B, S, H = x.shape
    L = cfg["num_layers"]
    bt = B if batch_tile is None else batch_tile
    assert B % bt == 0

    weights = [params[n] for n in _BLOCK_WEIGHT_NAMES]

    def w_spec(a):
        blk = (1,) + a.shape[1:]
        nd = a.ndim
        return pl.BlockSpec(blk, lambda i, l, _nd=nd: (l,) + (0,) * (_nd - 1))

    return pl.pallas_call(
        functools.partial(fused_blocks_kernel,
                          num_heads=cfg["num_heads"], eps=cfg["eps"]),
        out_shape=jax.ShapeDtypeStruct((B, S, H), jnp.float32),
        grid=(B // bt, L),
        in_specs=[pl.BlockSpec((bt, S, H), lambda i, l: (i, 0, 0))]
                 + [w_spec(a) for a in weights],
        out_specs=pl.BlockSpec((bt, S, H), lambda i, l: (i, 0, 0)),
        compiler_params=pltpu.CompilerParams(
            dimension_semantics=("parallel", "arbitrary")),
    )(x, *weights)


def run_final(x, gamma, beta, w_embed, eps, batch_tile=None):
    B, S, H = x.shape
    V = w_embed.shape[0]
    bt = B if batch_tile is None else batch_tile
    assert B % bt == 0
    return pl.pallas_call(
        functools.partial(final_kernel, eps=eps),
        out_shape=jax.ShapeDtypeStruct((B, S, V), jnp.float32),
        grid=(B // bt,),
        in_specs=[pl.BlockSpec((bt, S, H), lambda i: (i, 0, 0)),
                  pl.BlockSpec((1, H), lambda i: (0, 0)),
                  pl.BlockSpec((1, H), lambda i: (0, 0)),
                  pl.BlockSpec((V, H), lambda i: (0, 0))],
        out_specs=pl.BlockSpec((bt, S, V), lambda i: (i, 0, 0)),
        compiler_params=pltpu.CompilerParams(dimension_semantics=("parallel",)),
    )(x, gamma, beta, w_embed)


def transformer_forward(tokens, params, cfg):
    # token embedding (gather) + sinusoidal positional encoding: plain-JAX glue.
    x = jnp.take(params["w_embed"], tokens, axis=0).astype(jnp.float32)   # (B, S, H)
    x = x + params["pe"][: tokens.shape[1], :]
    # dropout: identity (eval)
    x = run_blocks(x, params, cfg)
    return run_final(x, params["g_f"], params["b_f"], params["w_embed"], cfg["eps"])


# --------------------------- parameters / reference --------------------------

def make_positional_encoding(max_seq_len, d):
    pos = jnp.arange(max_seq_len, dtype=jnp.float32)
    inv = 1.0 / (10000.0 ** (2.0 * jnp.arange(d // 2, dtype=jnp.float32) / d))
    ang = jnp.outer(pos, inv)
    pe = jnp.zeros((max_seq_len, d), jnp.float32)
    pe = pe.at[:, 0::2].set(jnp.sin(ang))
    pe = pe.at[:, 1::2].set(jnp.cos(ang))
    return pe


def make_params(key, cfg):
    L, H, V = cfg["num_layers"], cfg["hidden"], cfg["vocab_size"]
    k_emb, k_blocks = jax.random.split(key)
    bkeys = jax.random.split(k_blocks, L)

    def lin(k, out_f, in_f, scale=0.05):
        kw, kb = jax.random.split(k)
        return (scale * jax.random.normal(kw, (out_f, in_f), jnp.float32),
                scale * jax.random.normal(kb, (out_f,), jnp.float32))

    wq, wk, wv, bq, bk, bv = [], [], [], [], [], []
    wo, bo, w1, bm1, w2, bm2 = [], [], [], [], [], []
    for i in range(L):
        kqkv, ko, k1, k2 = jax.random.split(bkeys[i], 4)
        wqkv_i, bqkv_i = lin(kqkv, 3 * H, H)
        wq.append(wqkv_i[:H]);        bq.append(bqkv_i[:H])
        wk.append(wqkv_i[H:2 * H]);   bk.append(bqkv_i[H:2 * H])
        wv.append(wqkv_i[2 * H:]);    bv.append(bqkv_i[2 * H:])
        w, b = lin(ko, H, H);       wo.append(w); bo.append(b)
        w, b = lin(k1, 4 * H, H);   w1.append(w); bm1.append(b)
        w, b = lin(k2, H, 4 * H);   w2.append(w); bm2.append(b)

    def stack_w(ws):   # bf16 MXU weights, stacked over layers: (L, out, in)
        return jnp.stack(ws).astype(jnp.bfloat16)

    def stack_v(vs):   # f32 per-row vectors, stacked over layers: (L, 1, n)
        return jnp.stack(vs)[:, None, :].astype(jnp.float32)

    params = {
        "w_embed": jax.random.normal(k_emb, (V, H), jnp.float32).astype(jnp.bfloat16),
        "pe": make_positional_encoding(cfg["max_seq_len"], H),
        "g_f": jnp.ones((1, H), jnp.float32),
        "b_f": jnp.zeros((1, H), jnp.float32),
        "wq": stack_w(wq), "wk": stack_w(wk), "wv": stack_w(wv),
        "bq": stack_v(bq), "bk": stack_v(bk), "bv": stack_v(bv),
        "wo": stack_w(wo), "bo": stack_v(bo),
        "w1": stack_w(w1), "bm1": stack_v(bm1),
        "w2": stack_w(w2), "bm2": stack_v(bm2),
        "g1": jnp.ones((L, 1, H), jnp.float32), "be1": jnp.zeros((L, 1, H), jnp.float32),
        "g2": jnp.ones((L, 1, H), jnp.float32), "be2": jnp.zeros((L, 1, H), jnp.float32),
    }
    return params


def reference_forward(tokens, params, cfg):
    """Pure-jnp reference mirroring the PyTorch module (eval mode) with the same
    bf16-operand / f32-accumulate matmul convention as the kernels."""
    H, nh, eps, L = cfg["hidden"], cfg["num_heads"], cfg["eps"], cfg["num_layers"]
    hd = H // nh
    f32, bf16 = jnp.float32, jnp.bfloat16

    def ln(x, g, b):
        mu = x.mean(-1, keepdims=True)
        var = ((x - mu) ** 2).mean(-1, keepdims=True)
        return (x - mu) * lax.rsqrt(var + eps) * g + b

    def linear(x, w, b):
        return jnp.einsum("ri,oi->ro", x.astype(bf16), w,
                          preferred_element_type=f32) + b

    x = jnp.take(params["w_embed"], tokens, axis=0).astype(f32) + params["pe"][: tokens.shape[1], :]
    B, S, _ = x.shape
    causal = jnp.tril(jnp.ones((S, S), bool))
    x = x.reshape(B * S, H)
    for l in range(L):
        q = linear(x, params["wq"][l], params["bq"][l])
        k = linear(x, params["wk"][l], params["bk"][l])
        v = linear(x, params["wv"][l], params["bv"][l])

        def heads(t):
            return t.reshape(B, S, nh, hd).transpose(0, 2, 1, 3)

        qh, kh, vh = heads(q).astype(bf16), heads(k).astype(bf16), heads(v).astype(bf16)
        s = jnp.einsum("bhqd,bhkd->bhqk", qh, kh, preferred_element_type=f32) / math.sqrt(hd)
        s = jnp.where(causal, s, -1e9)
        p = jax.nn.softmax(s, axis=-1)
        o = jnp.einsum("bhqk,bhkd->bhqd", p.astype(bf16), vh, preferred_element_type=f32)
        o = o.transpose(0, 2, 1, 3).reshape(B * S, H)
        y = linear(o, params["wo"][l], params["bo"][l])
        x = x + ln(y, params["g1"][l], params["be1"][l])

        h = linear(x, params["w1"][l], params["bm1"][l])
        h = 0.5 * h * (1.0 + lax.erf(h / math.sqrt(2.0)))
        z = linear(h, params["w2"][l], params["bm2"][l])
        x = x + ln(z, params["g2"][l], params["be2"][l])

    x = ln(x, params["g_f"], params["b_f"])
    logits = jnp.einsum("rh,vh->rv", x.astype(bf16), params["w_embed"],
                        preferred_element_type=f32)
    return logits.reshape(B, S, -1)


# ---------------------------------- main --------------------------------------

if __name__ == "__main__":
    cfg = dict(num_layers=2, num_heads=4, vocab_size=64, hidden=32,
               max_seq_len=16, eps=1e-5)

    B, S = 2, 8
    key = jax.random.PRNGKey(0)
    k_tok, k_par = jax.random.split(key)
    tokens = jax.random.randint(k_tok, (B, S), 0, cfg["vocab_size"], dtype=jnp.int32)
    params = make_params(k_par, cfg)

    logits = transformer_forward(tokens, params, cfg)
    logits = jax.block_until_ready(logits)
    assert logits.shape == (B, S, cfg["vocab_size"]) and logits.dtype == jnp.float32

    ref = reference_forward(tokens, params, cfg)
    assert jnp.allclose(logits, ref, rtol=1e-2, atol=1e-2), "Pallas output mismatch vs reference"

    print("KERNEL_OK")
</pallas_src>

<mosaic_0001>
module attributes {stable_mosaic.version = 11 : i64} {
  func.func @fused_blocks_kernel(%arg0: i32, %arg1: i32, %arg2: memref<2x8x32xf32, #tpu.memory_space<vmem>>, %arg3: memref<1x32x32xbf16, #tpu.memory_space<vmem>>, %arg4: memref<1x32x32xbf16, #tpu.memory_space<vmem>>, %arg5: memref<1x32x32xbf16, #tpu.memory_space<vmem>>, %arg6: memref<1x1x32xf32, #tpu.memory_space<vmem>>, %arg7: memref<1x1x32xf32, #tpu.memory_space<vmem>>, %arg8: memref<1x1x32xf32, #tpu.memory_space<vmem>>, %arg9: memref<1x32x32xbf16, #tpu.memory_space<vmem>>, %arg10: memref<1x1x32xf32, #tpu.memory_space<vmem>>, %arg11: memref<1x1x32xf32, #tpu.memory_space<vmem>>, %arg12: memref<1x1x32xf32, #tpu.memory_space<vmem>>, %arg13: memref<1x128x32xbf16, #tpu.memory_space<vmem>>, %arg14: memref<1x1x128xf32, #tpu.memory_space<vmem>>, %arg15: memref<1x32x128xbf16, #tpu.memory_space<vmem>>, %arg16: memref<1x1x32xf32, #tpu.memory_space<vmem>>, %arg17: memref<1x1x32xf32, #tpu.memory_space<vmem>>, %arg18: memref<1x1x32xf32, #tpu.memory_space<vmem>>, %arg19: memref<2x8x32xf32, #tpu.memory_space<vmem>>) attributes {dimension_semantics = [#tpu.dimension_semantics<parallel>, #tpu.dimension_semantics<arbitrary>], iteration_bounds = array<i64: 1, 2>, scalar_prefetch = 0 : i64, scratch_operands = 0 : i64, tpu.core_type = #tpu.core_type<tc>, window_params = [{transform_indices = @transform_0, window_bounds = array<i64: 2, 8, 32>}, {transform_indices = @transform_1, window_bounds = array<i64: 1, 32, 32>}, {transform_indices = @transform_2, window_bounds = array<i64: 1, 32, 32>}, {transform_indices = @transform_3, window_bounds = array<i64: 1, 32, 32>}, {transform_indices = @transform_4, window_bounds = array<i64: 1, 1, 32>}, {transform_indices = @transform_5, window_bounds = array<i64: 1, 1, 32>}, {transform_indices = @transform_6, window_bounds = array<i64: 1, 1, 32>}, {transform_indices = @transform_7, window_bounds = array<i64: 1, 32, 32>}, {transform_indices = @transform_8, window_bounds = array<i64: 1, 1, 32>}, {transform_indices = @transform_9, window_bounds = array<i64: 1, 1, 32>}, {transform_indices = @transform_10, window_bounds = array<i64: 1, 1, 32>}, {transform_indices = @transform_11, window_bounds = array<i64: 1, 128, 32>}, {transform_indices = @transform_12, window_bounds = array<i64: 1, 1, 128>}, {transform_indices = @transform_13, window_bounds = array<i64: 1, 32, 128>}, {transform_indices = @transform_14, window_bounds = array<i64: 1, 1, 32>}, {transform_indices = @transform_15, window_bounds = array<i64: 1, 1, 32>}, {transform_indices = @transform_16, window_bounds = array<i64: 1, 1, 32>}, {transform_indices = @transform_17, window_bounds = array<i64: 2, 8, 32>}]} {
    %c0_i32 = arith.constant 0 : i32
    %0 = arith.cmpi eq, %arg1, %c0_i32 : i32
    %1 = arith.extui %0 : i1 to i32
    %c0_i32_0 = arith.constant 0 : i32
    %2 = arith.cmpi ne, %1, %c0_i32_0 : i32
    scf.if %2 {
      %c0_78 = arith.constant 0 : index
      %c0_79 = arith.constant 0 : index
      %c0_80 = arith.constant 0 : index
      %152 = vector.load %arg2[%c0_78, %c0_79, %c0_80] : memref<2x8x32xf32, #tpu.memory_space<vmem>>, vector<2x8x32xf32>
      %c0_81 = arith.constant 0 : index
      %c0_82 = arith.constant 0 : index
      %c0_83 = arith.constant 0 : index
      %153 = vector.load %arg19[%c0_81, %c0_82, %c0_83] : memref<2x8x32xf32, #tpu.memory_space<vmem>>, vector<2x8x32xf32>
      tpu.vector_store %arg19[%c0_81, %c0_82, %c0_83], %152 {strides = array<i32>} : memref<2x8x32xf32, #tpu.memory_space<vmem>>, vector<2x8x32xf32>,
    } else {
    }
    %c0 = arith.constant 0 : index
    %c0_1 = arith.constant 0 : index
    %c0_2 = arith.constant 0 : index
    %3 = vector.load %arg19[%c0, %c0_1, %c0_2] : memref<2x8x32xf32, #tpu.memory_space<vmem>>, vector<2x8x32xf32>
    %4 = vector.shape_cast %3 : vector<2x8x32xf32> to vector<16x32xf32>
    %5 = arith.truncf %4 : vector<16x32xf32> to vector<16x32xbf16>
    %c0_3 = arith.constant 0 : index
    %c0_4 = arith.constant 0 : index
    %c0_5 = arith.constant 0 : index
    %6 = vector.load %arg3[%c0_3, %c0_4, %c0_5] : memref<1x32x32xbf16, #tpu.memory_space<vmem>>, vector<1x32x32xbf16>
    %7 = vector.shape_cast %6 : vector<1x32x32xbf16> to vector<32x32xbf16>
    %c0_6 = arith.constant 0 : index
    %c0_7 = arith.constant 0 : index
    %c0_8 = arith.constant 0 : index
    %8 = vector.load %arg6[%c0_6, %c0_7, %c0_8] : memref<1x1x32xf32, #tpu.memory_space<vmem>>, vector<1x1x32xf32>
    %9 = vector.shape_cast %8 : vector<1x1x32xf32> to vector<1x32xf32>
    %cst = arith.constant dense<0.000000e+00> : vector<16x32xf32>
    %10 = tpu.matmul %5, %7, %cst {dimension_numbers = #tpu.dot_dimension_numbers<[1], [1], [0], [0], [0, 0, 1, 0], [], []>} : vector<16x32xbf16>, vector<32x32xbf16>, vector<16x32xf32> -> vector<16x32xf32>
    %11 = vector.broadcast %9 : vector<1x32xf32> to vector<16x32xf32>
    %12 = arith.addf %10, %11 : vector<16x32xf32>
    %c0_9 = arith.constant 0 : index
    %c0_10 = arith.constant 0 : index
    %c0_11 = arith.constant 0 : index
    %13 = vector.load %arg4[%c0_9, %c0_10, %c0_11] : memref<1x32x32xbf16, #tpu.memory_space<vmem>>, vector<1x32x32xbf16>
    %14 = vector.shape_cast %13 : vector<1x32x32xbf16> to vector<32x32xbf16>
    %c0_12 = arith.constant 0 : index
    %c0_13 = arith.constant 0 : index
    %c0_14 = arith.constant 0 : index
    %15 = vector.load %arg7[%c0_12, %c0_13, %c0_14] : memref<1x1x32xf32, #tpu.memory_space<vmem>>, vector<1x1x32xf32>
    %16 = vector.shape_cast %15 : vector<1x1x32xf32> to vector<1x32xf32>
    %cst_15 = arith.constant dense<0.000000e+00> : vector<16x32xf32>
    %17 = tpu.matmul %5, %14, %cst_15 {dimension_numbers = #tpu.dot_dimension_numbers<[1], [1], [0], [0], [0, 0, 1, 0], [], []>} : vector<16x32xbf16>, vector<32x32xbf16>, vector<16x32xf32> -> vector<16x32xf32>
    %18 = vector.broadcast %16 : vector<1x32xf32> to vector<16x32xf32>
    %19 = arith.addf %17, %18 : vector<16x32xf32>
    %c0_16 = arith.constant 0 : index
    %c0_17 = arith.constant 0 : index
    %c0_18 = arith.constant 0 : index
    %20 = vector.load %arg5[%c0_16, %c0_17, %c0_18] : memref<1x32x32xbf16, #tpu.memory_space<vmem>>, vector<1x32x32xbf16>
    %21 = vector.shape_cast %20 : vector<1x32x32xbf16> to vector<32x32xbf16>
    %c0_19 = arith.constant 0 : index
    %c0_20 = arith.constant 0 : index
    %c0_21 = arith.constant 0 : index
    %22 = vector.load %arg8[%c0_19, %c0_20, %c0_21] : memref<1x1x32xf32, #tpu.memory_space<vmem>>, vector<1x1x32xf32>
    %23 = vector.shape_cast %22 : vector<1x1x32xf32> to vector<1x32xf32>
    %cst_22 = arith.constant dense<0.000000e+00> : vector<16x32xf32>
    %24 = tpu.matmul %5, %21, %cst_22 {dimension_numbers = #tpu.dot_dimension_numbers<[1], [1], [0], [0], [0, 0, 1, 0], [], []>} : vector<16x32xbf16>, vector<32x32xbf16>, vector<16x32xf32> -> vector<16x32xf32>
    %25 = vector.broadcast %23 : vector<1x32xf32> to vector<16x32xf32>
    %26 = arith.addf %24, %25 : vector<16x32xf32>
    %27 = vector.shape_cast %12 : vector<16x32xf32> to vector<2x8x4x8xf32>
    %28 = tpu.transpose %27, [0, 2, 1, 3] : vector<2x8x4x8xf32> -> vector<2x4x8x8xf32>
    %29 = vector.shape_cast %28 : vector<2x4x8x8xf32> to vector<8x8x8xf32>
    %30 = arith.truncf %29 : vector<8x8x8xf32> to vector<8x8x8xbf16>
    %31 = vector.shape_cast %19 : vector<16x32xf32> to vector<2x8x4x8xf32>
    %32 = tpu.transpose %31, [0, 2, 1, 3] : vector<2x8x4x8xf32> -> vector<2x4x8x8xf32>
    %33 = vector.shape_cast %32 : vector<2x4x8x8xf32> to vector<8x8x8xf32>
    %34 = arith.truncf %33 : vector<8x8x8xf32> to vector<8x8x8xbf16>
    %35 = vector.shape_cast %26 : vector<16x32xf32> to vector<2x8x4x8xf32>
    %36 = tpu.transpose %35, [0, 2, 1, 3] : vector<2x8x4x8xf32> -> vector<2x4x8x8xf32>
    %37 = vector.shape_cast %36 : vector<2x4x8x8xf32> to vector<8x8x8xf32>
    %38 = arith.truncf %37 : vector<8x8x8xf32> to vector<8x8x8xbf16>
    "tpu.trace_start"() <{level = 10 : i32, message = "bqd,bkd->bqk"}> : () -> ()
    %cst_23 = arith.constant dense<0.000000e+00> : vector<8x8x8xf32>
    %39 = tpu.matmul %30, %34, %cst_23 {dimension_numbers = #tpu.dot_dimension_numbers<[2], [2], [1], [1], [0, 0, 0, 1, 1, 1], [0], [0]>} : vector<8x8x8xbf16>, vector<8x8x8xbf16>, vector<8x8x8xf32> -> vector<8x8x8xf32>
    "tpu.trace_stop"() : () -> ()
    %cst_24 = arith.constant 2.82842708 : f32
    %40 = vector.broadcast %cst_24 : f32 to vector<8x8x8xf32>
    %41 = arith.divf %39, %40 : vector<8x8x8xf32>
    %42 = tpu.iota {dimensions = array<i32: 0>} : vector<8x8xi32>
    %43 = tpu.iota {dimensions = array<i32: 1>} : vector<8x8xi32>
    %44 = arith.cmpi sle, %43, %42 : vector<8x8xi32>
    %45 = vector.shape_cast %44 : vector<8x8xi1> to vector<1x8x8xi1>
    %cst_25 = arith.constant -1.000000e+09 : f32
    %46 = vector.shape_cast %45 : vector<1x8x8xi1> to vector<1x8x8xi1>
    %47 = vector.broadcast %46 : vector<1x8x8xi1> to vector<8x8x8xi1>
    %48 = vector.broadcast %cst_25 : f32 to vector<8x8x8xf32>
    %49 = arith.select %47, %41, %48 : vector<8x8x8xi1>, vector<8x8x8xf32>
    %cst_26 = arith.constant dense<0xFF800000> : vector<8x8xf32>
    %50 = vector.multi_reduction <maximumf>, %49, %cst_26 [2] : vector<8x8x8xf32> to vector<8x8xf32>
    %51 = vector.shape_cast %50 : vector<8x8xf32> to vector<8x8x1xf32>
    %52 = vector.broadcast %51 : vector<8x8x1xf32> to vector<8x8x8xf32>
    %53 = arith.subf %49, %52 : vector<8x8x8xf32>
    %54 = math.exp %53 : vector<8x8x8xf32>
    %cst_27 = arith.constant dense<0.000000e+00> : vector<8x8xf32>
    %55 = vector.multi_reduction <add>, %54, %cst_27 [2] : vector<8x8x8xf32> to vector<8x8xf32>
    %56 = vector.shape_cast %55 : vector<8x8xf32> to vector<8x8x1xf32>
    %57 = vector.broadcast %56 : vector<8x8x1xf32> to vector<8x8x8xf32>
    %58 = arith.divf %54, %57 : vector<8x8x8xf32>
    %59 = arith.truncf %58 : vector<8x8x8xf32> to vector<8x8x8xbf16>
    "tpu.trace_start"() <{level = 10 : i32, message = "bqk,bkd->bqd"}> : () -> ()
    %cst_28 = arith.constant dense<0.000000e+00> : vector<8x8x8xf32>
    %60 = tpu.matmul %59, %38, %cst_28 {dimension_numbers = #tpu.dot_dimension_numbers<[2], [1], [1], [2], [0, 0, 0, 1, 1, 2], [0], [0]>} : vector<8x8x8xbf16>, vector<8x8x8xbf16>, vector<8x8x8xf32> -> vector<8x8x8xf32>
    "tpu.trace_stop"() : () -> ()
    %61 = vector.shape_cast %60 : vector<8x8x8xf32> to vector<2x4x8x8xf32>
    %62 = tpu.transpose %61, [0, 2, 1, 3] : vector<2x4x8x8xf32> -> vector<2x8x4x8xf32>
    %63 = vector.shape_cast %62 : vector<2x8x4x8xf32> to vector<16x32xf32>
    %64 = arith.truncf %63 : vector<16x32xf32> to vector<16x32xbf16>
    %c0_29 = arith.constant 0 : index
    %c0_30 = arith.constant 0 : index
    %c0_31 = arith.constant 0 : index
    %65 = vector.load %arg9[%c0_29, %c0_30, %c0_31] : memref<1x32x32xbf16, #tpu.memory_space<vmem>>, vector<1x32x32xbf16>
    %66 = vector.shape_cast %65 : vector<1x32x32xbf16> to vector<32x32xbf16>
    %c0_32 = arith.constant 0 : index
    %c0_33 = arith.constant 0 : index
    %c0_34 = arith.constant 0 : index
    %67 = vector.load %arg10[%c0_32, %c0_33, %c0_34] : memref<1x1x32xf32, #tpu.memory_space<vmem>>, vector<1x1x32xf32>
    %68 = vector.shape_cast %67 : vector<1x1x32xf32> to vector<1x32xf32>
    %cst_35 = arith.constant dense<0.000000e+00> : vector<16x32xf32>
    %69 = tpu.matmul %64, %66, %cst_35 {dimension_numbers = #tpu.dot_dimension_numbers<[1], [1], [0], [0], [0, 0, 1, 0], [], []>} : vector<16x32xbf16>, vector<32x32xbf16>, vector<16x32xf32> -> vector<16x32xf32>
    %70 = vector.broadcast %68 : vector<1x32xf32> to vector<16x32xf32>
    %71 = arith.addf %69, %70 : vector<16x32xf32>
    %c0_36 = arith.constant 0 : index
    %c0_37 = arith.constant 0 : index
    %c0_38 = arith.constant 0 : index
    %72 = vector.load %arg11[%c0_36, %c0_37, %c0_38] : memref<1x1x32xf32, #tpu.memory_space<vmem>>, vector<1x1x32xf32>
    %73 = vector.shape_cast %72 : vector<1x1x32xf32> to vector<1x32xf32>
    %c0_39 = arith.constant 0 : index
    %c0_40 = arith.constant 0 : index
    %c0_41 = arith.constant 0 : index
    %74 = vector.load %arg12[%c0_39, %c0_40, %c0_41] : memref<1x1x32xf32, #tpu.memory_space<vmem>>, vector<1x1x32xf32>
    %75 = vector.shape_cast %74 : vector<1x1x32xf32> to vector<1x32xf32>
    %cst_42 = arith.constant dense<0.000000e+00> : vector<16xf32>
    %76 = vector.multi_reduction <add>, %71, %cst_42 [1] : vector<16x32xf32> to vector<16xf32>
    %77 = vector.shape_cast %76 : vector<16xf32> to vector<16x1xf32>
    %cst_43 = arith.constant 3.200000e+01 : f32
    %78 = vector.broadcast %cst_43 : f32 to vector<16x1xf32>
    %79 = arith.divf %77, %78 : vector<16x1xf32>
    %80 = vector.broadcast %79 : vector<16x1xf32> to vector<16x32xf32>
    %81 = arith.subf %71, %80 : vector<16x32xf32>
    %82 = arith.mulf %81, %81 : vector<16x32xf32>
    %cst_44 = arith.constant dense<0.000000e+00> : vector<16xf32>
    %83 = vector.multi_reduction <add>, %82, %cst_44 [1] : vector<16x32xf32> to vector<16xf32>
    %84 = vector.shape_cast %83 : vector<16xf32> to vector<16x1xf32>
    %cst_45 = arith.constant 3.200000e+01 : f32
    %85 = vector.broadcast %cst_45 : f32 to vector<16x1xf32>
    %86 = arith.divf %84, %85 : vector<16x1xf32>
    %87 = vector.broadcast %79 : vector<16x1xf32> to vector<16x32xf32>
    %88 = arith.subf %71, %87 : vector<16x32xf32>
    %cst_46 = arith.constant 9.99999974E-6 : f32
    %89 = vector.broadcast %cst_46 : f32 to vector<16x1xf32>
    %90 = arith.addf %86, %89 : vector<16x1xf32>
    %91 = math.rsqrt %90 : vector<16x1xf32>
    %92 = vector.broadcast %91 : vector<16x1xf32> to vector<16x32xf32>
    %93 = arith.mulf %88, %92 : vector<16x32xf32>
    %94 = vector.broadcast %73 : vector<1x32xf32> to vector<16x32xf32>
    %95 = arith.mulf %93, %94 : vector<16x32xf32>
    %96 = vector.broadcast %75 : vector<1x32xf32> to vector<16x32xf32>
    %97 = arith.addf %95, %96 : vector<16x32xf32>
    %98 = arith.addf %4, %97 : vector<16x32xf32>
    %99 = arith.truncf %98 : vector<16x32xf32> to vector<16x32xbf16>
    %c0_47 = arith.constant 0 : index
    %c0_48 = arith.constant 0 : index
    %c0_49 = arith.constant 0 : index
    %100 = vector.load %arg13[%c0_47, %c0_48, %c0_49] : memref<1x128x32xbf16, #tpu.memory_space<vmem>>, vector<1x128x32xbf16>
    %101 = vector.shape_cast %100 : vector<1x128x32xbf16> to vector<128x32xbf16>
    %c0_50 = arith.constant 0 : index
    %c0_51 = arith.constant 0 : index
    %c0_52 = arith.constant 0 : index
    %102 = vector.load %arg14[%c0_50, %c0_51, %c0_52] : memref<1x1x128xf32, #tpu.memory_space<vmem>>, vector<1x1x128xf32>
    %103 = vector.shape_cast %102 : vector<1x1x128xf32> to vector<1x128xf32>
    %cst_53 = arith.constant dense<0.000000e+00> : vector<16x128xf32>
    %104 = tpu.matmul %99, %101, %cst_53 {dimension_numbers = #tpu.dot_dimension_numbers<[1], [1], [0], [0], [0, 0, 1, 0], [], []>} : vector<16x32xbf16>, vector<128x32xbf16>, vector<16x128xf32> -> vector<16x128xf32>
    %105 = vector.broadcast %103 : vector<1x128xf32> to vector<16x128xf32>
    %106 = arith.addf %104, %105 : vector<16x128xf32>
    %cst_54 = arith.constant 5.000000e-01 : f32
    %107 = vector.broadcast %cst_54 : f32 to vector<16x128xf32>
    %108 = arith.mulf %107, %106 : vector<16x128xf32>
    %cst_55 = arith.constant 1.41421354 : f32
    %109 = vector.broadcast %cst_55 : f32 to vector<16x128xf32>
    %110 = arith.divf %106, %109 : vector<16x128xf32>
    %111 = math.erf %110 : vector<16x128xf32>
    %cst_56 = arith.constant 1.000000e+00 : f32
    %112 = vector.broadcast %cst_56 : f32 to vector<16x128xf32>
    %113 = arith.addf %112, %111 : vector<16x128xf32>
    %114 = arith.mulf %108, %113 : vector<16x128xf32>
    %115 = arith.truncf %114 : vector<16x128xf32> to vector<16x128xbf16>
    %c0_57 = arith.constant 0 : index
    %c0_58 = arith.constant 0 : index
    %c0_59 = arith.constant 0 : index
    %116 = vector.load %arg15[%c0_57, %c0_58, %c0_59] : memref<1x32x128xbf16, #tpu.memory_space<vmem>>, vector<1x32x128xbf16>
    %117 = vector.shape_cast %116 : vector<1x32x128xbf16> to vector<32x128xbf16>
    %c0_60 = arith.constant 0 : index
    %c0_61 = arith.constant 0 : index
    %c0_62 = arith.constant 0 : index
    %118 = vector.load %arg16[%c0_60, %c0_61, %c0_62] : memref<1x1x32xf32, #tpu.memory_space<vmem>>, vector<1x1x32xf32>
    %119 = vector.shape_cast %118 : vector<1x1x32xf32> to vector<1x32xf32>
    %cst_63 = arith.constant dense<0.000000e+00> : vector<16x32xf32>
    %120 = tpu.matmul %115, %117, %cst_63 {dimension_numbers = #tpu.dot_dimension_numbers<[1], [1], [0], [0], [0, 0, 1, 0], [], []>} : vector<16x128xbf16>, vector<32x128xbf16>, vector<16x32xf32> -> vector<16x32xf32>
    %121 = vector.broadcast %119 : vector<1x32xf32> to vector<16x32xf32>
    %122 = arith.addf %120, %121 : vector<16x32xf32>
    %c0_64 = arith.constant 0 : index
    %c0_65 = arith.constant 0 : index
    %c0_66 = arith.constant 0 : index
    %123 = vector.load %arg17[%c0_64, %c0_65, %c0_66] : memref<1x1x32xf32, #tpu.memory_space<vmem>>, vector<1x1x32xf32>
    %124 = vector.shape_cast %123 : vector<1x1x32xf32> to vector<1x32xf32>
    %c0_67 = arith.constant 0 : index
    %c0_68 = arith.constant 0 : index
    %c0_69 = arith.constant 0 : index
    %125 = vector.load %arg18[%c0_67, %c0_68, %c0_69] : memref<1x1x32xf32, #tpu.memory_space<vmem>>, vector<1x1x32xf32>
    %126 = vector.shape_cast %125 : vector<1x1x32xf32> to vector<1x32xf32>
    %cst_70 = arith.constant dense<0.000000e+00> : vector<16xf32>
    %127 = vector.multi_reduction <add>, %122, %cst_70 [1] : vector<16x32xf32> to vector<16xf32>
    %128 = vector.shape_cast %127 : vector<16xf32> to vector<16x1xf32>
    %cst_71 = arith.constant 3.200000e+01 : f32
    %129 = vector.broadcast %cst_71 : f32 to vector<16x1xf32>
    %130 = arith.divf %128, %129 : vector<16x1xf32>
    %131 = vector.broadcast %130 : vector<16x1xf32> to vector<16x32xf32>
    %132 = arith.subf %122, %131 : vector<16x32xf32>
    %133 = arith.mulf %132, %132 : vector<16x32xf32>
    %cst_72 = arith.constant dense<0.000000e+00> : vector<16xf32>
    %134 = vector.multi_reduction <add>, %133, %cst_72 [1] : vector<16x32xf32> to vector<16xf32>
    %135 = vector.shape_cast %134 : vector<16xf32> to vector<16x1xf32>
    %cst_73 = arith.constant 3.200000e+01 : f32
    %136 = vector.broadcast %cst_73 : f32 to vector<16x1xf32>
    %137 = arith.divf %135, %136 : vector<16x1xf32>
    %138 = vector.broadcast %130 : vector<16x1xf32> to vector<16x32xf32>
    %139 = arith.subf %122, %138 : vector<16x32xf32>
    %cst_74 = arith.constant 9.99999974E-6 : f32
    %140 = vector.broadcast %cst_74 : f32 to vector<16x1xf32>
    %141 = arith.addf %137, %140 : vector<16x1xf32>
    %142 = math.rsqrt %141 : vector<16x1xf32>
    %143 = vector.broadcast %142 : vector<16x1xf32> to vector<16x32xf32>
    %144 = arith.mulf %139, %143 : vector<16x32xf32>
    %145 = vector.broadcast %124 : vector<1x32xf32> to vector<16x32xf32>
    %146 = arith.mulf %144, %145 : vector<16x32xf32>
    %147 = vector.broadcast %126 : vector<1x32xf32> to vector<16x32xf32>
    %148 = arith.addf %146, %147 : vector<16x32xf32>
    %149 = arith.addf %98, %148 : vector<16x32xf32>
    %150 = vector.shape_cast %149 : vector<16x32xf32> to vector<2x8x32xf32>
    %c0_75 = arith.constant 0 : index
    %c0_76 = arith.constant 0 : index
    %c0_77 = arith.constant 0 : index
    %151 = vector.load %arg19[%c0_75, %c0_76, %c0_77] : memref<2x8x32xf32, #tpu.memory_space<vmem>>, vector<2x8x32xf32>
    tpu.vector_store %arg19[%c0_75, %c0_76, %c0_77], %150 {strides = array<i32>} : memref<2x8x32xf32, #tpu.memory_space<vmem>>, vector<2x8x32xf32>,
    return
  }
  func.func @transform_0(%arg0: i32, %arg1: i32) -> (i32, i32, i32) {
    %c0_i32 = arith.constant 0 : i32
    %c0_i32_0 = arith.constant 0 : i32
    %c0_i32_1 = arith.constant 0 : i32
    return %arg0, %c0_i32, %c0_i32_0 : i32, i32, i32
  }
  func.func @transform_1(%arg0: i32, %arg1: i32) -> (i32, i32, i32) {
    %c0_i32 = arith.constant 0 : i32
    %c0_i32_0 = arith.constant 0 : i32
    %c0_i32_1 = arith.constant 0 : i32
    return %arg1, %c0_i32, %c0_i32_0 : i32, i32, i32
  }
  func.func @transform_2(%arg0: i32, %arg1: i32) -> (i32, i32, i32) {
    %c0_i32 = arith.constant 0 : i32
    %c0_i32_0 = arith.constant 0 : i32
    %c0_i32_1 = arith.constant 0 : i32
    return %arg1, %c0_i32, %c0_i32_0 : i32, i32, i32
  }
  func.func @transform_3(%arg0: i32, %arg1: i32) -> (i32, i32, i32) {
    %c0_i32 = arith.constant 0 : i32
    %c0_i32_0 = arith.constant 0 : i32
    %c0_i32_1 = arith.constant 0 : i32
    return %arg1, %c0_i32, %c0_i32_0 : i32, i32, i32
  }
  func.func @transform_4(%arg0: i32, %arg1: i32) -> (i32, i32, i32) {
    %c0_i32 = arith.constant 0 : i32
    %c0_i32_0 = arith.constant 0 : i32
    %c0_i32_1 = arith.constant 0 : i32
    return %arg1, %c0_i32, %c0_i32_0 : i32, i32, i32
  }
  func.func @transform_5(%arg0: i32, %arg1: i32) -> (i32, i32, i32) {
    %c0_i32 = arith.constant 0 : i32
    %c0_i32_0 = arith.constant 0 : i32
    %c0_i32_1 = arith.constant 0 : i32
    return %arg1, %c0_i32, %c0_i32_0 : i32, i32, i32
  }
  func.func @transform_6(%arg0: i32, %arg1: i32) -> (i32, i32, i32) {
    %c0_i32 = arith.constant 0 : i32
    %c0_i32_0 = arith.constant 0 : i32
    %c0_i32_1 = arith.constant 0 : i32
    return %arg1, %c0_i32, %c0_i32_0 : i32, i32, i32
  }
  func.func @transform_7(%arg0: i32, %arg1: i32) -> (i32, i32, i32) {
    %c0_i32 = arith.constant 0 : i32
    %c0_i32_0 = arith.constant 0 : i32
    %c0_i32_1 = arith.constant 0 : i32
    return %arg1, %c0_i32, %c0_i32_0 : i32, i32, i32
  }
  func.func @transform_8(%arg0: i32, %arg1: i32) -> (i32, i32, i32) {
    %c0_i32 = arith.constant 0 : i32
    %c0_i32_0 = arith.constant 0 : i32
    %c0_i32_1 = arith.constant 0 : i32
    return %arg1, %c0_i32, %c0_i32_0 : i32, i32, i32
  }
  func.func @transform_9(%arg0: i32, %arg1: i32) -> (i32, i32, i32) {
    %c0_i32 = arith.constant 0 : i32
    %c0_i32_0 = arith.constant 0 : i32
    %c0_i32_1 = arith.constant 0 : i32
    return %arg1, %c0_i32, %c0_i32_0 : i32, i32, i32
  }
  func.func @transform_10(%arg0: i32, %arg1: i32) -> (i32, i32, i32) {
    %c0_i32 = arith.constant 0 : i32
    %c0_i32_0 = arith.constant 0 : i32
    %c0_i32_1 = arith.constant 0 : i32
    return %arg1, %c0_i32, %c0_i32_0 : i32, i32, i32
  }
  func.func @transform_11(%arg0: i32, %arg1: i32) -> (i32, i32, i32) {
    %c0_i32 = arith.constant 0 : i32
    %c0_i32_0 = arith.constant 0 : i32
    %c0_i32_1 = arith.constant 0 : i32
    return %arg1, %c0_i32, %c0_i32_0 : i32, i32, i32
  }
  func.func @transform_12(%arg0: i32, %arg1: i32) -> (i32, i32, i32) {
    %c0_i32 = arith.constant 0 : i32
    %c0_i32_0 = arith.constant 0 : i32
    %c0_i32_1 = arith.constant 0 : i32
    return %arg1, %c0_i32, %c0_i32_0 : i32, i32, i32
  }
  func.func @transform_13(%arg0: i32, %arg1: i32) -> (i32, i32, i32) {
    %c0_i32 = arith.constant 0 : i32
    %c0_i32_0 = arith.constant 0 : i32
    %c0_i32_1 = arith.constant 0 : i32
    return %arg1, %c0_i32, %c0_i32_0 : i32, i32, i32
  }
  func.func @transform_14(%arg0: i32, %arg1: i32) -> (i32, i32, i32) {
    %c0_i32 = arith.constant 0 : i32
    %c0_i32_0 = arith.constant 0 : i32
    %c0_i32_1 = arith.constant 0 : i32
    return %arg1, %c0_i32, %c0_i32_0 : i32, i32, i32
  }
  func.func @transform_15(%arg0: i32, %arg1: i32) -> (i32, i32, i32) {
    %c0_i32 = arith.constant 0 : i32
    %c0_i32_0 = arith.constant 0 : i32
    %c0_i32_1 = arith.constant 0 : i32
    return %arg1, %c0_i32, %c0_i32_0 : i32, i32, i32
  }
  func.func @transform_16(%arg0: i32, %arg1: i32) -> (i32, i32, i32) {
    %c0_i32 = arith.constant 0 : i32
    %c0_i32_0 = arith.constant 0 : i32
    %c0_i32_1 = arith.constant 0 : i32
    return %arg1, %c0_i32, %c0_i32_0 : i32, i32, i32
  }
  func.func @transform_17(%arg0: i32, %arg1: i32) -> (i32, i32, i32) {
    %c0_i32 = arith.constant 0 : i32
    %c0_i32_0 = arith.constant 0 : i32
    %c0_i32_1 = arith.constant 0 : i32
    return %arg0, %c0_i32, %c0_i32_0 : i32, i32, i32
  }
}

</mosaic_0001>

<bundles_post_ra>
// kernel: tpu_custom_call.1
= control target key start
LH: loop header
LB: loop body
LE: loop exit
PB: predicated region body
PF: predicated region fallthrough
CT: control target
= control target key end

     0   :  { %s5332_s0 = inlined_call_operand.hbm [shape: f32[2,8,32], index: 0, kind: input, shape index: {}]   ;;  %s5333_s1 = inlined_call_operand.vmem [shape: bf16[2,32,32], index: 1, kind: input, shape index: {}]   ;;  %s5334_s2 = inlined_call_operand.vmem [shape: bf16[2,32,32], index: 2, kind: input, shape index: {}]   ;;  %s5335_s3 = inlined_call_operand.vmem [shape: bf16[2,32,32], index: 3, kind: input, shape index: {}]   ;;  %s5336_s4 = inlined_call_operand.vmem [shape: f32[2,1,32], index: 4, kind: input, shape index: {}]   ;;  %s5337_s5 = inlined_call_operand.vmem [shape: f32[2,1,32], index: 5, kind: input, shape index: {}]   ;;  %s5338_s6 = inlined_call_operand.vmem [shape: f32[2,1,32], index: 6, kind: input, shape index: {}]   ;;  %s5339_s7 = inlined_call_operand.vmem [shape: bf16[2,32,32], index: 7, kind: input, shape index: {}]   ;;  %s5340_s8 = inlined_call_operand.vmem [shape: f32[2,1,32], index: 8, kind: input, shape index: {}]   ;;  %s5341_s9 = inlined_call_operand.hbm [shape: f32[2,1,32], index: 9, kind: input, shape index: {}]   ;;  %s5342_s10 = inlined_call_operand.hbm [shape: f32[2,1,32], index: 10, kind: input, shape index: {}]   ;;  %s5343_s11 = inlined_call_operand.vmem [shape: bf16[2,128,32], index: 11, kind: input, shape index: {}]   ;;  %s5344_s12 = inlined_call_operand.vmem [shape: f32[2,1,128], index: 12, kind: input, shape index: {}]   ;;  %s5345_s13 = inlined_call_operand.vmem [shape: bf16[2,32,128], index: 13, kind: input, shape index: {}]   ;;  %s5346_s14 = inlined_call_operand.vmem [shape: f32[2,1,32], index: 14, kind: input, shape index: {}]   ;;  %s5347_s15 = inlined_call_operand.vmem [shape: f32[2,1,32], index: 15, kind: input, shape index: {}]   ;;  %s5348_s16 = inlined_call_operand.vmem [shape: f32[2,1,32], index: 16, kind: input, shape index: {}]   ;;  %s5349_s17 = inlined_call_operand.hbm [shape: f32[2,8,32], index: 17, kind: output, shape index: {}]  }
   0x1   :  { %5368 = sst [smem:[#allocation22_spill]] %s5332_s0 }
   0x2   :  { %5369 = sst [smem:[#allocation23_spill]] %s5333_s1 }
   0x3   :  { %5370 = sst [smem:[#allocation24_spill]] %s5334_s2 }
   0x4   :  { %5371 = sst [smem:[#allocation25_spill]] %s5335_s3 }
   0x5   :  { %5372 = sst [smem:[#allocation26_spill]] %s5339_s7 }
   0x6   :  { %5373 = sst [smem:[#allocation27_spill]] %s5340_s8 }
   0x7   :  { %5374 = sst [smem:[#allocation28_spill]] %s5341_s9 }
   0x8   :  { %5375 = sst [smem:[#allocation29_spill]] %s5342_s10 }
   0x9   :  { %5376 = sst [smem:[#allocation30_spill]] %s5343_s11 }
   0xa   :  { %5377 = sst [smem:[#allocation31_spill]] %s5345_s13 }
   0xb   :  { %5378 = sst [smem:[#allocation32_spill]] %s5346_s14 }
   0xc   :  { %5379 = sst [smem:[#allocation33_spill]] %s5347_s15 }
   0xd   :  { %5380 = sst [smem:[#allocation34_spill]] %s5348_s16 }
   0xe   :  { %5381 = sst [smem:[#allocation35_spill]] %s5349_s17 }
   0xf   :  { %22 = vsyncpa [#allocation3], 0 }
  0x10   :  { %23 = vsyncpa [#allocation6], 0 }
  0x11   :  { %25 = vsyncpa [#allocation6 + $0x1], 0 }
  0x12   :  { %26 = vsyncpa [#allocation4], 0  ;;  %s4516_s24 = smov 0   ;;  %s4518_s25 = smov 0  }
  0x13   :  { %s4520_s26 = smov 0   ;;  %s4522_s27 = smov 0  }
  0x14   :  { %s4524_s28 = smov 0   ;;  %s4526_s29 = smov 0  }
  0x15 LB: > { %5382 = sst [smem:[#allocation12_spill]] %s4391_s25  ;;  %s41_s0 = sadd.s32 1, %s4403_s28  ;;  %s4407_s29 = sphi %s4526_s29, %s32_s29   ;;  %s4403_s28 = sphi %s4524_s28, %s5437_s28   ;;  %s4399_s27 = sphi %s4522_s27, %s5436_s27   ;;  %s4395_s26 = sphi %s4520_s26, %s5435_s26   ;;  %s4391_s25 = sphi %s4518_s25, %s5434_s25   ;;  %s4387_s24 = sphi %s4516_s24, %s5433_s24  }
  0x16   : > { %5383 = sst [smem:[#allocation13_spill]] %s4395_s26  ;;  %s285_s30 = sadd.s32 1, %s4395_s26 }
  0x17   : > { %5384 = sst [smem:[#allocation14_spill]] %s4403_s28  ;;  %p42_p0 = scmp.ge.s32.totalorder %s41_s0, 2 }
  0x18   : > { %5385 = sst [smem:[#allocation15_spill]] %s4407_s29  ;;  %p292_p1 = scmp.ne.s32.totalorder %s4395_s26, %s4391_s25 }
  0x19   : > { %p293_p2 = scmp.eq.s32.totalorder %s4407_s29, 0  ;;  %s5439_s0 = smov (%p42_p0, %s41_s0), 0 }
  0x1a   : > { %5386 = sst [smem:[#allocation16_spill]] %s5439_s0  ;;  %p4089_p4 = scmp.lt.s32.totalorder %s4407_s29, 2 }
  0x1b   : > { %p294_p3 = por %p293_p2, %p292_p1  ;;  %s282_s18 = ssub.s32 %s4403_s28, %s5439_s0 }
  0x1c   : > { %s602_s19 = sand.u32 1, %s4407_s29   ;;  %p283_p5 = scmp.eq.s32.totalorder %s282_s18, 0 }
  0x1d   : > { %s5353_s1 = sand.u32 1, %s4395_s26   ;;  %s5354_s20 = sshll.u32 %s4403_s28, 4 }
  0x1e   : > { %s4560_s21 = scalar_select %p283_p5, %s4395_s26, %s285_s30  }
  0x1f   : > { %s5388_s9 = sld [smem:[#allocation28_spill]]  ;;  %s605_s16 = scalar_lea.vmem [#allocation5], %s5353_s1 }
  0x20   : > { %5387 = sst [smem:[#allocation17_spill]] %s4560_s21  ;;  %s612_s15 = sshll.u32 %s605_s16, 4  ;;  %s4575_s15 = int_to_ptr.vmem [resolvable:$true] %s612_s15 }
  0x21   : > { %p4571_p6 = pnand %p4089_p4, %p294_p3  ;;  %s4577_s30 = scalar_lea.sflag [#allocation6], %s602_s19 }
  0x23   : > { %p4237_p8 = pneg %p4571_p6 }
  0x25   : > { %s4567_s17 = scalar_lea.hbm %s5388_s9, %s5354_s20  ;;  %s4240_s23 = scalar_lea.hbm %s5388_s9, 32 }
  0x26   : > { %s4235_s18 = scalar_lea.hbm %s4567_s17, 16  ;;  %p4241_p11 = scmp.lt.u32.totalorder %s4567_s17, %s5388_s9 }
  0x27   : > { %p4236_p7 = scmp.ne.s32.totalorder %s4567_s17, %s4235_s18  ;;  %p4242_p12 = scmp.lt.u32.totalorder %s4240_s23, %s4235_s18 }
  0x28   : > { %p4244_p0 = scmp.lt.u32.totalorder %s4235_s18, %s4567_s17 }
  0x29   : > { %p4238_p9 = pnand %p4237_p8, %p4236_p7  ;;  %p4243_p13 = por %p4242_p12, %p4241_p11 }
  0x2b   : > { %p4239_p10 = pneg %p4238_p9  ;;  %p4245_p1 = por %p4244_p0, %p4243_p13 }
  0x2d   : > { %p4246_p2 = pnand %p4245_p1, %p4239_p10 }
  0x2f   : > { %4249 = shalt.err (!%p4246_p2)
}
  0x30   : > { %s4250_s19 = scalar_lea.vmem %s4575_s15, 16  ;;  %s4409_s22 = smov [#allocation5]  }
  0x31   : > { %p4251_p3 = scmp.ne.s32.totalorder %s4575_s15, %s4250_s19  ;;  %s4255_s16 = sshll.u32 %s4409_s22, 4  ;;  %s4256_s16 = int_to_ptr.vmem [resolvable:$false] %s4255_s16 }
  0x32   : > { %s4257_s1 = scalar_lea.vmem %s4256_s16, 32  ;;  %p4258_p7 = scmp.lt.s32.totalorder %s4575_s15, %s4256_s16 }
  0x33   : > { %p4253_p4 = pnand %p4251_p3, %p4237_p8  ;;  %p4259_p9 = scmp.lt.s32.totalorder %s4257_s1, %s4250_s19 }
  0x35   : > { %p4254_p5 = pneg %p4253_p4  ;;  %p4260_p11 = por %p4259_p9, %p4258_p7 }
  0x37   : > { %p4261_p12 = pnand %p4260_p11, %p4254_p5 }
  0x39   : > { %4264 = shalt.err (!%p4261_p12)
}
  0x3a   : > { %4084 = dma.hbm_to_vmem [thread:$0]  (!%p4571_p6), %s4567_s17, 16, %s4575_s15, %s4577_s30  }
  0x3b   : > { %s4606_s20 = sadd.s32 4294967295, %s4407_s29   ;;  %p298_p10 = scmp.ne.s32.totalorder %s4391_s25, %s4387_s24 }
  0x3c   : > { %5390 = sst [smem:[#allocation18_spill]] %s4606_s20  ;;  %p5358_p13 = scmp.eq.s32.totalorder %s4606_s20, 0 }
  0x3d   : > { %p3758_p0 = scmp.ge.s32.totalorder %s4407_s29, 1  ;;  %p517_p1 = scmp.lt.s32.totalorder %s4407_s29, 3 }
  0x3e   : > { %p4615_p2 = por %p5358_p13, %p298_p10  ;;  %s4410_s15 = smov [#allocation2]  }
  0x3f   : > { %p4619_p3 = pnand %p3758_p0, %p517_p1  ;;  %s532_s17 = sshll.u32 %s4410_s15, 4  ;;  %s4630_s17 = int_to_ptr.vmem [resolvable:$true] %s532_s17 }
  0x40   : > { %s5391_s18 = scalar_select %p4615_p2, 1, 0 }
  0x41   : > { %s5392_s23 = scalar_select %p4619_p3, 1, 0 }
  0x42   : > { %s5393_s19 = sshll.u32 %s4403_s28, 4  ;;  %s5394_s10 = sld [smem:[#allocation29_spill]] }
  0x43   : > { %p4077_p4 = pneg %p4619_p3  ;;  %s5395_s1 = sand.u32 1, %s4395_s26  }
  0x44   : > { %s622_s9 = scalar_lea.vmem [#allocation7], %s5395_s1 }
  0x45   : > { %s629_s21 = sshll.u32 %s622_s9, 4  ;;  %p4638_p5 = pnand %p4077_p4, %p5358_p13  ;;  %s630_s21 = int_to_ptr.vmem [resolvable:$true] %s629_s21 }
  0x47   : > { %s5396_s15 = scalar_select %p4638_p5, 1, 0 }
  0x48   : > { %s4628_s24 = scalar_lea.hbm %s5394_s10, %s5393_s19  ;;  %s4270_s28 = scalar_lea.hbm %s5394_s10, 32 }
  0x49   : > { %s4265_s22 = scalar_lea.hbm %s4628_s24, 16  ;;  %p4271_p12 = scmp.lt.u32.totalorder %s4628_s24, %s5394_s10 }
  0x4a   : > { %p4266_p7 = scmp.ne.s32.totalorder %s4628_s24, %s4265_s22  ;;  %p4272_p10 = scmp.lt.u32.totalorder %s4270_s28, %s4265_s22 }
  0x4b   : > { %p4274_p1 = scmp.lt.u32.totalorder %s4265_s22, %s4628_s24 }
  0x4c   : > { %p4268_p9 = pnand %p4266_p7, %p4237_p8  ;;  %p4273_p0 = por %p4272_p10, %p4271_p12 }
  0x4e   : > { %p4269_p11 = pneg %p4268_p9  ;;  %p4275_p4 = por %p4274_p1, %p4273_p0 }
  0x50   : > { %p4276_p13 = pnand %p4275_p4, %p4269_p11 }
  0x52   : > { %4279 = shalt.err (!%p4276_p13)
}
  0x53   : > { %s4280_s9 = scalar_lea.vmem %s630_s21, 16  ;;  %s4411_s1 = smov [#allocation7]  }
  0x54   : > { %p4281_p2 = scmp.ne.s32.totalorder %s630_s21, %s4280_s9  ;;  %s4285_s19 = sshll.u32 %s4411_s1, 4  ;;  %s4286_s19 = int_to_ptr.vmem [resolvable:$false] %s4285_s19 }
  0x55   : > { %s4287_s16 = scalar_lea.vmem %s4286_s19, 32  ;;  %p4288_p3 = scmp.lt.s32.totalorder %s630_s21, %s4286_s19 }
  0x56   : > { %p4283_p7 = pnand %p4281_p2, %p4237_p8  ;;  %p4289_p5 = scmp.lt.s32.totalorder %s4287_s16, %s4280_s9 }
  0x58   : > { %p4284_p9 = pneg %p4283_p7  ;;  %p4290_p10 = por %p4289_p5, %p4288_p3 }
  0x5a   : > { %p4291_p12 = pnand %p4290_p10, %p4284_p9 }
  0x5c   : > { %4294 = shalt.err (!%p4291_p12)
}
  0x5d   : > { %4087 = dma.hbm_to_vmem [thread:$0]  (!%p4571_p6), %s4628_s24, 16, %s630_s21, %s4577_s30  }
  0x5e   : > { %s5397_s29 = sld [smem:[#allocation22_spill]]  ;;  %p5399_p13 = scmp.ne.s32.totalorder %s5396_s15, 0 }
  0x60   : > { %p4297_p2 = pneg %p5399_p13 }
  0x64   : > { %s5398_s22 = smov %s5397_s29  ;;  %s4295_s10 = scalar_lea.hbm %s5397_s29, 256 }
  0x65   : > { %p4296_p8 = scmp.ne.s32.totalorder %s5398_s22, %s4295_s10  ;;  %p4302_p5 = scmp.lt.u32.totalorder %s4295_s10, %s5398_s22 }
  0x67   : > { %p4298_p11 = pnand %p4297_p2, %p4296_p8 }
  0x69   : > { %p4299_p3 = pneg %p4298_p11 }
  0x6b   : > { %p4304_p0 = pnand %p4302_p5, %p4299_p3 }
  0x6d   : > { %4307 = shalt.err (!%p4304_p0)
}
  0x6e   : > { %s4308_s0 = scalar_lea.vmem %s4630_s17, 256  ;;  %p4316_p7 = scmp.lt.s32.totalorder %s4630_s17, %s4630_s17 }
  0x6f   : > { %p4309_p6 = scmp.ne.s32.totalorder %s4630_s17, %s4308_s0  ;;  %p4317_p9 = scmp.lt.s32.totalorder %s4308_s0, %s4308_s0 }
  0x71   : > { %p4311_p1 = pnand %p4309_p6, %p4297_p2  ;;  %p4318_p10 = por %p4317_p9, %p4316_p7 }
  0x73   : > { %p4312_p4 = pneg %p4311_p1 }
  0x75   : > { %p4319_p12 = pnand %p4318_p10, %p4312_p4 }
  0x77   : > { %4322 = shalt.err (!%p4319_p12)
}
  0x78   : > { %s4412_s13 = smov 128   ;;  %s4413_s14 = smov 8  }
  0x79   : > { %4080 = dma.hbm_to_vmem [thread:$0]  (!%p5399_p13), %s5398_s22, 256, %s4630_s17, [#allocation3], %s4412_s13, %s4412_s13, %s4413_s14  }
  0x7a   : > { %p5400_p8 = scmp.ne.s32.totalorder %s5392_s23, 0 }
  0x7c   : > { %678 = sbr.rel (%p5400_p8) target bundleno = 2880 (0xb40), region = 88 }
  0x83   : > { %p5401_p2 = scmp.eq.s32.totalorder %s4606_s20, 0 }
  0x85   : > { %4374 = dma.done.wait (%p5401_p2), [#allocation3], 256   ;;  %p5402_p11 = pmov %p5401_p2 }
  0x86   : > { %s684_s30 = sand.u32 1, %s4606_s20   ;;  %s686_s24 = sand.u32 1, %s4391_s25  }
  0x87   : > { %4376 = vsyncadd (%p5402_p11), [#allocation3], 4294967040  ;;  %s685_s19 = scalar_lea.sflag [#allocation6], %s684_s30  ;;  %s4691_s15 = scalar_lea.vmem [#allocation5], %s686_s24 }
  0x88   : > { %5403 = sst [smem:[#allocation19_spill]] %s4691_s15  ;;  %p5404_p3 = scmp.ne.s32.totalorder %s5391_s18, 0 }
  0x8a   : > { %4378 = dma.done.wait (%p5404_p3), %s685_s19, 32  }
  0x8b   : > { %4380 = vsyncadd (%p5404_p3), %s685_s19, 4294967264  ;;  %p799_p13 = scmp.lt.s32.totalorder %s4399_s27, 1  ;;  %s5405_s9 = sld [smem:[#allocation23_spill]] }
  0x8c   : > { %s5406_s2 = sld [smem:[#allocation24_spill]]  ;;  %s5407_s3 = sld [smem:[#allocation25_spill]] }
  0x8d   : > { %s4699_s23 = scalar_select %p799_p13, %s4399_s27, 1 }
  0x8e   : > { %s5408_s7 = sld [smem:[#allocation26_spill]]  ;;  %s5411_s11 = sld [smem:[#allocation30_spill]] }
  0x8f   : > { %s3847_s17 = sshll.u32 %s4699_s23, 4  ;;  %s3851_s10 = sshll.u32 %s4699_s23, 6 }
  0x90   : > { %s838_s16 = scalar_lea.vmem %s5344_s12, %s4699_s23  ;;  %s5413_s25 = sld [smem:[#allocation31_spill]] }
  0x91   : > { %s803_s1 = scalar_lea.vmem %s5405_s9, %s3847_s17  ;;  %s5414_s15 = sld [smem:[#allocation32_spill]] }
  0x92   : > { %s4712_s14 = scalar_lea.vmem %s5406_s2, %s3847_s17  ;;  %s4717_s30 = scalar_lea.vmem %s5407_s3, %s3847_s17 }
  0x93   : > { %s5415_s8 = sld [smem:[#allocation33_spill]]  ;;  %s5416_s21 = sld [smem:[#allocation34_spill]] }
  0x94   : > { %s4730_s9 = scalar_lea.vmem %s5408_s7, %s3847_s17  ;;  %s4740_s20 = scalar_lea.vmem %s5411_s11, %s3851_s10 }
  0x95   : > { %5409 = sst [smem:[#allocation20_spill]] %s4730_s9  ;;  %p3777_p5 = scmp.ne.s32.totalorder %s4399_s27, 0 }
  0x96   : > { %5412 = sst [smem:[#allocation21_spill]] %s4740_s20  ;;  %s4749_s28 = scalar_lea.vmem %s5413_s25, %s3847_s17  ;;  %v859_v0 = vld [vmem:[#allocation2] sm:$0xff] (!%p3777_p5)  ;;  %vm861_vm0 = vcmask (!%p3777_p5), 261120   ;;  %v860_v1 = vld [vmem:[#allocation2 + $0x8] sm:$0xff] (!%p3777_p5) }
  0x97   : > { %s846_s0 = scalar_lea.vmem %s5414_s15, %s4699_s23  ;;  %s4763_s20 = scalar_lea.vmem [#allocation7], %s686_s24  ;;  %862 = vst.msk [vmem:[#allocation8] sm:$0xff] (!%p3777_p5), %vm861_vm0, %v859_v0  ;;  %863 = vst.msk [vmem:[#allocation8 + $0x8] sm:$0xff] (!%p3777_p5), %vm861_vm0, %v860_v1 }
  0x98   : > { %858 = sbr.rel (%p3777_p5) target bundleno = 159 (0x9f), region = 104 }
  0x99   : > { %s849_s9 = scalar_lea.vmem %s5415_s8, %s4699_s23  ;;  %s852_s11 = scalar_lea.vmem %s5416_s21, %s4699_s23 }
  0x9f PF: > { %v4171_v2 = vld [vmem:[%s803_s1] sm:$0xff]   ;;  %v4414_v3 = vmov 0.0   ;;  %vm888_vm1 = vcmask 261120   ;;  %v4172_v5 = vld [vmem:[%s803_s1 + $0x8] sm:$0xff]   ;;  %vm4415_vm2 = vmmov 0   ;;  %v864_v7 = vld [vmem:[#allocation8] sm:$0xff]  ;;  %s5417_s8 = scalar_lea.vmem %s5337_s5, %s4699_s23  ;;  %s5418_s24 = scalar_lea.vmem %s5336_s4, %s4699_s23  ;;  %v1100_v34 = vlaneseq }
  0xa0   : > { %3909 = vmatprep.subr.bf16.mxu0 %v4414_v3  ;;  %3933 = vmatprep.subr.bf16.mxu1 %v4414_v3  ;;  %v893_v4 = vsel %vm888_vm1, %v4171_v2, 0  ;;  %v896_v6 = vsel %vm888_vm1, %v4172_v5, 0  ;;  %v865_v8 = vld [vmem:[#allocation8 + $0x8] sm:$0xff]  ;;  %v4174_v12 = vld [vmem:[%s4712_s14 + $0x8] sm:$0xff]   ;;  %s4416_s15 = smov 104   ;;  %s4417_s17 = smov 120  }
  0xa1   : > { %3910 = vmatpush3.bf16.xpose.msra.mxu0 %v893_v4  ;;  %3913 = vmatprep.mubr.msk.bf16.mxu0 %vm4415_vm2, %v4414_v3  ;;  %v4173_v9 = vld [vmem:[%s4712_s14] sm:$0xff]   ;;  %v866_v10 = vpack.c.bf16 %v865_v8, %v864_v7  ;;  %v964_v13 = vsel %vm888_vm1, %v4174_v12, 0  ;;  %v4176_v16 = vld [vmem:[%s4717_s30 + $0x8] sm:$0xff]   ;;  %s4418_s18 = smov 112   ;;  %v4419_v32 = vmov 1983009808  }
  0xa2   : > { %3911 = vmatprep.subr.bf16.mxu0 %v4414_v3  ;;  %3935 = vmatprep.mubr.msk.bf16.mxu1 %vm4415_vm2, %v4414_v3  ;;  %v961_v11 = vsel %vm888_vm1, %v4173_v9, 0  ;;  %v4175_v14 = vld [vmem:[%s4717_s30] sm:$0xff]   ;;  %v1032_v17 = vsel %vm888_vm1, %v4176_v16, 0  ;;  %v1098_v33 = vunpack.c.l.s4 %v4419_v32  ;;  %v4420_v35 = vmov 1934713408   ;;  %s5419_s30 = scalar_lea.vmem %s5338_s6, %s4699_s23  ;;  %s5422_s22 = sld [smem:[#allocation20_spill]] }
  0xa3   : > { %v1029_v15 = vsel %vm888_vm1, %v4175_v14, 0  ;;  %v3782_v22 = vld [vmem:[%s5417_s8] ss:$0 sm:$0xff]  ;;  %v1130_v36 = vunpack.c.l.s4 %v4420_v35  ;;  %v4830_v38 = vshrl.u32 %v1100_v34, 7  ;;  %vm1975_vm3 = vcmask 64512   ;;  %s4421_s19 = smov 16  }
  0xa4   : > { %v3778_v26 = vld [vmem:[%s5418_s24] ss:$0 sm:$0xff]  ;;  %v1099_v37 = vunpack.c.0.s8 %v1098_v33  ;;  %vm2467_vm5 = vcmask 1043456   ;;  %s4422_s26 = smov 8   ;;  %s4423_s29 = smov 24   ;;  %vm3131_vm6 = vcmask 130048  }
  0xa5   : > { %v1131_v41 = vunpack.c.0.s8 %v1130_v36  ;;  %v4840_v49 = vld [vmem:[%s5419_s30] ss:$0 sm:$0xff]  ;;  %vm3134_vm7 = vcmask 195584   ;;  %s5423_s13 = sld [smem:[#allocation21_spill]]  ;;  %s5424_s21 = sld [smem:[#allocation27_spill]] }
  0xa6   : > { %v4833_v42 = vsub.s32 %v1099_v37, %v4830_v38  ;;  %s5426_s7 = sld [smem:[#allocation19_spill]]  ;;  %s4424_s14 = smov [#allocation8]  }
  0xa7   : > { %v4843_v50 = vsub.s32 %v1131_v41, %v4830_v38  ;;  %s3521_s30 = sshll.u32 %s4424_s14, 4  ;;  %s3522_s30 = int_to_ptr.vmem [resolvable:$true] %s3521_s30 }
  0xa8   : > { %p4330_p7 = scmp.lt.s32.totalorder %s3522_s30, %s3522_s30 }
  0xa9   : > { %3912 = vmatpush3.bf16.xpose.msra.mxu0 %v896_v6 }
  0xaa   : > { %3917 = vmatprep.subr.bf16.mxu0 %v4414_v3 }
  0xab   : > { %s5425_s2 = scalar_lea.vmem %s5424_s21, %s4699_s23  ;;  %s4323_s23 = scalar_lea.vmem %s3522_s30, 256 }
  0xac   : > { %p4324_p6 = scmp.ne.s32.totalorder %s3522_s30, %s4323_s23  ;;  %p4331_p9 = scmp.lt.s32.totalorder %s4323_s23, %s4323_s23 }
  0xae   : > { %p4332_p10 = por %p4331_p9, %p4330_p7 }
  0xb0   : > { %3914 = vmatmul.mubr.msk.bf16.vlgmr.msra.gmra.mrb[0].mxu0 %vm888_vm1, %v866_v10 }
  0xb1   : > { %3918 = vmatpush3.bf16.xpose.msra.mxu0 %v961_v11  ;;  %3921 = vmatprep.mubr.msk.bf16.mxu0 %vm4415_vm2, %v4414_v3 }
  0xb2   : > { %3919 = vmatprep.subr.bf16.mxu0 %v4414_v3 }
  0xb9   : > { %3920 = vmatpush3.bf16.xpose.msra.mxu0 %v964_v13 }
  0xba   : > { %3925 = vmatprep.subr.bf16.mxu0 %v4414_v3 }
  0xc0   : > { %3922 = vmatmul.mubr.msk.bf16.vlgmr.msra.gmra.mrb[4].mxu0 %vm888_vm1, %v866_v10 }
  0xc1   : > { %3929 = vmatprep.mubr.msk.bf16.mxu0 %vm4415_vm2, %v4414_v3  ;;  %3926 = vmatpush3.bf16.xpose.msra.mxu0 %v1029_v15 }
  0xc2   : > { %3927 = vmatprep.subr.bf16.mxu0 %v4414_v3 }
  0xc9   : > { %3928 = vmatpush3.bf16.xpose.msra.mxu0 %v1032_v17 }
  0xca   : > { %3945 = vmatprep.subr.bf16.mxu0 %v4414_v3 }
  0xd0   : > { %3930 = vmatmul.mubr.msk.bf16.vlgmr.msra.gmra.mrb[8].mxu0 %vm888_vm1, %v866_v10 }
  0xd1   : > { %3947 = vmatprep.mubr.msk.bf16.mxu0 %vm4415_vm2, %v4414_v3 }
 0x183   : > { %v932_v18 = vpop.f32.mrb[0].mxu0 }
 0x184   : > { %v3915_v19 = vpop.f32.mrb[1].mxu0  ;;  %v933_v29 = vadd.f32 %v3778_v26, %v932_v18 }
 0x185   : > { %v935_v20 = vpop.f32.mrb[2].mxu0 }
 0x186   : > { %v3916_v21 = vpop.f32.mrb[3].mxu0  ;;  %v4819_v31 = vadd.f32 %v3778_v26, %v935_v20 }
 0x193   : > { %v1000_v23 = vpop.f32.mrb[4].mxu0 }
 0x194   : > { %v1001_v24 = vadd.f32 %v3782_v22, %v1000_v23  ;;  %v3923_v25 = vpop.f32.mrb[5].mxu0 }
 0x195   : > { %v1003_v27 = vpop.f32.mrb[6].mxu0 }
 0x196   : > { %1389 = vrot.lane.b32.xlu1 %v1001_v24, %s4416_s15  ;;  %1377 = vrot.lane.b32.xlu0 %v1001_v24, %s4417_s17  ;;  %v3924_v28 = vpop.f32.mrb[7].mxu0  ;;  %v4813_v30 = vadd.f32 %v3782_v22, %v1003_v27 }
 0x19a   : > { %1077 = vrot.lane.b32.xlu1 %v933_v29, %s4417_s17  ;;  %1383 = vrot.lane.b32.xlu0 %v1001_v24, %s4418_s18 }
 0x19e   : > { %1089 = vrot.lane.b32.xlu1 %v933_v29, %s4416_s15  ;;  %1083 = vrot.lane.b32.xlu0 %v933_v29, %s4418_s18 }
 0x1a2   : > { %1385 = vrot.lane.b32.xlu1 %v4813_v30, %s4418_s18  ;;  %1379 = vrot.lane.b32.xlu0 %v4813_v30, %s4417_s17 }
 0x1a3   : > { %v1068_v55 = vpop.f32.mrb[8].mxu0 }
 0x1a4   : > { %v4850_v58 = vadd.f32 %v4840_v49, %v1068_v55  ;;  %v3931_v63 = vpop.f32.mrb[9].mxu0 }
 0x1a5   : > { %v4854_v5 = vpop.f32.mrb[10].mxu0 }
 0x1a6   : > { %1079 = vrot.lane.b32.xlu1 %v4819_v31, %s4417_s17  ;;  %1391 = vrot.lane.b32.xlu0 %v4813_v30, %s4416_s15  ;;  %v3932_v10 = vpop.f32.mrb[11].mxu0 }
 0x1aa   : > { %1091 = vrot.lane.b32.xlu1 %v4819_v31, %s4416_s15  ;;  %1085 = vrot.lane.b32.xlu0 %v4819_v31, %s4418_s18 }
 0x1ae   : > { %1677 = vrot.lane.b32.xlu1 %v4850_v58, %s4417_s17 }
 0x208   : > { %v1390_v39 = vpop.permute.xlu1 %1389  ;;  %v1378_v40 = vpop.permute.xlu0 %1377 }
 0x209   : > { %v1411_v43 = vcombine.low %v1378_v40, %v1390_v39  ;;  %v1412_v44 = vcombine.high %v1378_v40, %v1390_v39 }
 0x20b   : > { %v1419_v51 = vrot.slane %v1411_v43, %v4833_v42  ;;  %v1426_v52 = vrot.slane %v1412_v44, %v4833_v42 }
 0x20c   : > { %v1078_v45 = vpop.permute.xlu1 %1077  ;;  %v1384_v46 = vpop.permute.xlu0 %1383 }
 0x20d   : > { %v1395_v47 = vcombine.low %v1001_v24, %v1384_v46  ;;  %v1396_v48 = vcombine.high %v1001_v24, %v1384_v46 }
 0x20f   : > { %v1403_v53 = vrot.slane %v1395_v47, %v4833_v42  ;;  %v1410_v54 = vrot.slane %v1396_v48, %v4833_v42 }
 0x210   : > { %v1090_v56 = vpop.permute.xlu1 %1089  ;;  %v1084_v57 = vpop.permute.xlu0 %1083 }
 0x211   : > { %v1427_v59 = vcombine.low %v1403_v53, %v1419_v51  ;;  %v1428_v60 = vcombine.high %v1403_v53, %v1419_v51  ;;  %v1443_v61 = vcombine.low %v1410_v54, %v1426_v52  ;;  %v1444_v62 = vcombine.high %v1410_v54, %v1426_v52 }
 0x212   : > { %v1111_v0 = vcombine.low %v1078_v45, %v1090_v56  ;;  %v1112_v1 = vcombine.high %v1078_v45, %v1090_v56  ;;  %v1095_v2 = vcombine.low %v933_v29, %v1084_v57  ;;  %v1096_v4 = vcombine.high %v933_v29, %v1084_v57 }
 0x213   : > { %v1435_v6 = vrot.slane %v1427_v59, %v4843_v50  ;;  %v1442_v7 = vrot.slane %v1428_v60, %v4843_v50  ;;  %v1451_v8 = vrot.slane %v1443_v61, %v4843_v50  ;;  %v1458_v9 = vrot.slane %v1444_v62, %v4843_v50 }
 0x214   : > { %v1119_v11 = vrot.slane %v1111_v0, %v4833_v42  ;;  %v1126_v12 = vrot.slane %v1112_v1, %v4833_v42  ;;  %v1103_v13 = vrot.slane %v1095_v2, %v4833_v42  ;;  %v1110_v14 = vrot.slane %v1096_v4, %v4833_v42  ;;  %v1386_v15 = vpop.permute.xlu1 %1385  ;;  %v1380_v16 = vpop.permute.xlu0 %1379 }
 0x215   : > { %v1531_v17 = vcombine.low %v1435_v6, %v1442_v7  ;;  %v3794_v18 = vcombine.high %v1435_v6, %v1442_v7  ;;  %v1547_v23 = vcombine.low %v1451_v8, %v1458_v9  ;;  %v3795_v24 = vcombine.high %v1451_v8, %v1458_v9 }
 0x216   : > { %v1127_v19 = vcombine.low %v1103_v13, %v1119_v11  ;;  %v1128_v20 = vcombine.high %v1103_v13, %v1119_v11  ;;  %v1143_v21 = vcombine.low %v1110_v14, %v1126_v12  ;;  %v1144_v22 = vcombine.high %v1110_v14, %v1126_v12 }
 0x217   : > { %v1463_v25 = vcombine.low %v4813_v30, %v1386_v15  ;;  %v1464_v26 = vcombine.high %v4813_v30, %v1386_v15  ;;  %v1538_v39 = vrot.slane %v1531_v17, %v4833_v42  ;;  %v1546_v40 = vrot.slane %v3794_v18, %v4833_v42 }
 0x218   : > { %v1135_v27 = vrot.slane %v1127_v19, %v4843_v50  ;;  %v1142_v28 = vrot.slane %v1128_v20, %v4843_v50  ;;  %v1151_v29 = vrot.slane %v1143_v21, %v4843_v50  ;;  %v1158_v32 = vrot.slane %v1144_v22, %v4843_v50  ;;  %v1080_v33 = vpop.permute.xlu1 %1079  ;;  %v1392_v35 = vpop.permute.xlu0 %1391 }
 0x219   : > { %v1479_v36 = vcombine.low %v1380_v16, %v1392_v35  ;;  %v1480_v37 = vcombine.high %v1380_v16, %v1392_v35  ;;  %v1471_v45 = vrot.slane %v1463_v25, %v4833_v42  ;;  %v1478_v46 = vrot.slane %v1464_v26, %v4833_v42 }
 0x21a   : > { %v1231_v41 = vcombine.low %v1135_v27, %v1142_v28  ;;  %v3790_v43 = vcombine.high %v1135_v27, %v1142_v28  ;;  %v1247_v44 = vcombine.low %v1151_v29, %v1158_v32  ;;  %v3791_v30 = vcombine.high %v1151_v29, %v1158_v32 }
 0x21b   : > { %v1487_v47 = vrot.slane %v1479_v36, %v4833_v42  ;;  %v1494_v48 = vrot.slane %v1480_v37, %v4833_v42  ;;  %v1554_v0 = vrot.slane %v1547_v23, %v4833_v42  ;;  %v1562_v1 = vrot.slane %v3795_v24, %v4833_v42 }
 0x21c   : > { %v4877_v51 = vrot.slane %v1231_v41, %v4833_v42  ;;  %v4880_v52 = vrot.slane %v3790_v43, %v4833_v42  ;;  %v4883_v53 = vrot.slane %v1247_v44, %v4833_v42  ;;  %v4886_v54 = vrot.slane %v3791_v30, %v4833_v42  ;;  %v1092_v55 = vpop.permute.xlu1 %1091  ;;  %v1086_v61 = vpop.permute.xlu0 %1085 }
 0x21d   : > { %v1495_v56 = vcombine.low %v1471_v45, %v1487_v47  ;;  %v1496_v57 = vcombine.high %v1471_v45, %v1487_v47  ;;  %v1511_v59 = vcombine.low %v1478_v46, %v1494_v48  ;;  %v1512_v60 = vcombine.high %v1478_v46, %v1494_v48 }
 0x21e   : > { %v1179_v62 = vcombine.low %v1080_v33, %v1092_v55  ;;  %v1180_v63 = vcombine.high %v1080_v33, %v1092_v55  ;;  %v1163_v10 = vcombine.low %v4819_v31, %v1086_v61  ;;  %v1164_v11 = vcombine.high %v4819_v31, %v1086_v61 }
 0x21f   : > { %v1503_v2 = vrot.slane %v1495_v56, %v4843_v50  ;;  %v1510_v4 = vrot.slane %v1496_v57, %v4843_v50  ;;  %v1519_v6 = vrot.slane %v1511_v59, %v4843_v50  ;;  %v1526_v7 = vrot.slane %v1512_v60, %v4843_v50 }
 0x220   : > { %v1187_v8 = vrot.slane %v1179_v62, %v4833_v42  ;;  %v1194_v9 = vrot.slane %v1180_v63, %v4833_v42  ;;  %v1264_v12 = vcombine.high %v4877_v51, %v4880_v52  ;;  %v1280_v13 = vcombine.high %v4883_v53, %v4886_v54 }
 0x221   : > { %v1599_v14 = vcombine.low %v1503_v2, %v1510_v4  ;;  %v3796_v15 = vcombine.high %v1503_v2, %v1510_v4  ;;  %v1171_v16 = vrot.slane %v1163_v10, %v4833_v42  ;;  %v1178_v17 = vrot.slane %v1164_v11, %v4833_v42 }
 0x222   : > { %v1563_v18 = vcombine.low %v1538_v39, %v1546_v40  ;;  %v1579_v19 = vcombine.low %v1554_v0, %v1562_v1  ;;  %v1615_v21 = vcombine.low %v1519_v6, %v1526_v7  ;;  %v3797_v22 = vcombine.high %v1519_v6, %v1526_v7 }
 0x223   : > { %v4905_v20 = vrot.slane %v1599_v14, %v4833_v42  ;;  %v1614_v31 = vrot.slane %v3796_v15, %v4833_v42  ;;  %v1195_v23 = vcombine.low %v1171_v16, %v1187_v8  ;;  %v1196_v24 = vcombine.high %v1171_v16, %v1187_v8 }
 0x224   : > { %v1211_v25 = vcombine.low %v1178_v17, %v1194_v9  ;;  %v1212_v26 = vcombine.high %v1178_v17, %v1194_v9  ;;  %v1571_v27 = vrot.slane %v1563_v18, %v4843_v50  ;;  %v1587_v28 = vrot.slane %v1579_v19, %v4843_v50 }
 0x225   : > { %v1564_v29 = vcombine.high %v1538_v39, %v1546_v40  ;;  %v1580_v32 = vcombine.high %v1554_v0, %v1562_v1  ;;  %v1203_v33 = vrot.slane %v1195_v23, %v4843_v50  ;;  %v1210_v35 = vrot.slane %v1196_v24, %v4843_v50 }
 0x226   : > { %v1219_v36 = vrot.slane %v1211_v25, %v4843_v50  ;;  %v1226_v37 = vrot.slane %v1212_v26, %v4843_v50  ;;  %v1595_v41 = vcombine.low %v1571_v27, %v1587_v28  ;;  %v1263_v30 = vcombine.low %v4877_v51, %v4880_v52 }
 0x227   : > { %v1578_v43 = vrot.slane %v1564_v29, %v4843_v50  ;;  %v1594_v44 = vrot.slane %v1580_v32, %v4843_v50  ;;  %v1299_v45 = vcombine.low %v1203_v33, %v1210_v35  ;;  %v3792_v46 = vcombine.high %v1203_v33, %v1210_v35 }
 0x228   : > { %v1315_v39 = vcombine.low %v1219_v36, %v1226_v37  ;;  %v3793_v40 = vcombine.high %v1219_v36, %v1226_v37  ;;  %v1667_v47 = vpack.c.bf16 %v1595_v41, %v1595_v41  ;;  %v1271_v55 = vrot.slane %v1263_v30, %v4843_v50 }
 0x229   : > { %v1597_v48 = vcombine.low %v1578_v43, %v1594_v44  ;;  %v1279_v56 = vcombine.low %v4883_v53, %v4886_v54  ;;  %v1622_v57 = vrot.slane %v1615_v21, %v4833_v42  ;;  %v1630_v59 = vrot.slane %v3797_v22, %v4833_v42 }
 0x22a   : > { %v1306_v60 = vrot.slane %v1299_v45, %v4833_v42  ;;  %v1314_v61 = vrot.slane %v3792_v46, %v4833_v42  ;;  %v1980_v51 = vsel %vm1975_vm3, %v1667_v47, 0  ;;  %v1278_v63 = vrot.slane %v1264_v12, %v4843_v50 }
 0x22b   : > { %v1669_v52 = vpack.c.bf16 %v1597_v48, %v1597_v48  ;;  %v1287_v62 = vrot.slane %v1279_v56, %v4843_v50  ;;  %v1322_v0 = vrot.slane %v1315_v39, %v4833_v42  ;;  %v1330_v1 = vrot.slane %v3793_v40, %v4833_v42  ;;  %3934 = vmatpush3.bf16.xpose.msra.mxu1 %v1980_v51 }
 0x22c   : > { %3939 = vmatprep.subr.bf16.mxu1 %v4414_v3  ;;  %v1294_v2 = vrot.slane %v1280_v13, %v4843_v50  ;;  %v1596_v4 = vcombine.high %v1571_v27, %v1587_v28  ;;  %v1631_v6 = vcombine.low %v4905_v20, %v1614_v31  ;;  %v1647_v7 = vcombine.low %v1622_v57, %v1630_v59 }
 0x22d   : > { %v2072_v53 = vsel %vm1975_vm3, %v1669_v52, 0  ;;  %v1295_v54 = vcombine.low %v1271_v55, %v1287_v62  ;;  %v1331_v8 = vcombine.low %v1306_v60, %v1314_v61  ;;  %v1347_v10 = vcombine.low %v1322_v0, %v1330_v1 }
 0x22e   : > { %3946 = vmatpush3.bf16.xpose.msra.mxu0 %v2072_v53  ;;  %v1297_v9 = vcombine.low %v1278_v63, %v1294_v2  ;;  %v1668_v11 = vpack.c.bf16 %v1596_v4, %v1596_v4  ;;  %v1639_v12 = vrot.slane %v1631_v6, %v4843_v50  ;;  %v1655_v14 = vrot.slane %v1647_v7, %v4843_v50 }
 0x22f   : > { %3957 = vmatprep.subr.bf16.mxu0 %v4414_v3  ;;  %v1367_v15 = vpack.c.bf16 %v1295_v54, %v1295_v54  ;;  %v1632_v16 = vcombine.high %v4905_v20, %v1614_v31  ;;  %v1648_v17 = vcombine.high %v1622_v57, %v1630_v59  ;;  %v1598_v18 = vcombine.high %v1578_v43, %v1594_v44 }
 0x230   : > { %v1663_v13 = vcombine.low %v1639_v12, %v1655_v14  ;;  %v1369_v19 = vpack.c.bf16 %v1297_v9, %v1297_v9  ;;  %v2026_v21 = vsel %vm1975_vm3, %v1668_v11, 0  ;;  %v1339_v25 = vrot.slane %v1331_v8, %v4843_v50 }
 0x231   : > { %v1646_v22 = vrot.slane %v1632_v16, %v4843_v50  ;;  %v1662_v23 = vrot.slane %v1648_v17, %v4843_v50  ;;  %v1355_v20 = vrot.slane %v1347_v10, %v4843_v50  ;;  %v1296_v31 = vcombine.high %v1271_v55, %v1287_v62 }
 0x232   : > { %3936 = vmatmul.mubr.msk.bf16.vlgmr.msra.gmra.mrb[0].mxu1 %vm1975_vm3, %v1367_v15  ;;  %v1671_v24 = vpack.c.bf16 %v1663_v13, %v1663_v13  ;;  %v1670_v28 = vpack.c.bf16 %v1598_v18, %v1598_v18  ;;  %v4953_v29 = vadd.f32 %v4840_v49, %v4854_v5  ;;  %v1332_v32 = vcombine.high %v1306_v60, %v1314_v61 }
 0x233   : > { %3940 = vmatpush3.bf16.xpose.msra.mxu1 %v2026_v21  ;;  %3941 = vmatprep.mubr.msk.bf16.mxu1 %vm4415_vm2, %v4414_v3  ;;  %v1665_v27 = vcombine.low %v1646_v22, %v1662_v23  ;;  %v1348_v33 = vcombine.high %v1322_v0, %v1330_v1  ;;  %v1363_v35 = vcombine.low %v1339_v25, %v1355_v20  ;;  %v2356_v52 = vand.u32 127, %v1100_v34 }
 0x234   : > { %3951 = vmatprep.subr.bf16.mxu1 %v4414_v3  ;;  %v2164_v26 = vsel %vm1975_vm3, %v1671_v24, 0  ;;  %v1368_v36 = vpack.c.bf16 %v1296_v31, %v1296_v31  ;;  %v2118_v41 = vsel %vm1975_vm3, %v1670_v28, 0  ;;  %v1664_v43 = vcombine.high %v1639_v12, %v1655_v14 }
 0x235   : > { %3948 = vmatmul.mubr.msk.bf16.vlgmr.msra.gmra.mrb[12].mxu0 %vm1975_vm3, %v1369_v19  ;;  %v1673_v37 = vpack.c.bf16 %v1665_v27, %v1665_v27  ;;  %v1371_v44 = vpack.c.bf16 %v1363_v35, %v1363_v35  ;;  %v1346_v49 = vrot.slane %v1332_v32, %v4843_v50  ;;  %v1362_v5 = vrot.slane %v1348_v33, %v4843_v50 }
 0x236   : > { %3959 = vmatprep.mubr.msk.bf16.mxu0 %vm4415_vm2, %v4414_v3  ;;  %3958 = vmatpush3.bf16.xpose.msra.mxu0 %v2164_v26  ;;  %v1298_v30 = vcombine.high %v1278_v63, %v1294_v2  ;;  %v1672_v46 = vpack.c.bf16 %v1664_v43, %v1664_v43  ;;  %v1666_v48 = vcombine.high %v1646_v22, %v1662_v23 }
 0x237   : > { %3969 = vmatprep.subr.bf16.mxu0 %v4414_v3  ;;  %v2256_v45 = vsel %vm1975_vm3, %v1673_v37, 0  ;;  %v1365_v39 = vcombine.low %v1346_v49, %v1362_v5  ;;  %v1364_v56 = vcombine.high %v1339_v25, %v1355_v20  ;;  %v1366_v61 = vcombine.high %v1346_v49, %v1362_v5 }
 0x238   : > { %v1370_v40 = vpack.c.bf16 %v1298_v30, %v1298_v30  ;;  %v2210_v47 = vsel %vm1975_vm3, %v1672_v46, 0  ;;  %v1674_v57 = vpack.c.bf16 %v1666_v48, %v1666_v48  ;;  %vm4986_vm4 = vcmp.le.s32.totalorder %v2356_v52, %v4830_v38 }
 0x239   : > { %v1373_v55 = vpack.c.bf16 %v1365_v39, %v1365_v39  ;;  %v1372_v59 = vpack.c.bf16 %v1364_v56, %v1364_v56  ;;  %v1374_v51 = vpack.c.bf16 %v1366_v61, %v1366_v61 }
 0x23a   : > { %3942 = vmatmul.mubr.msk.bf16.vlgmr.msra.gmra.mrb[4].mxu1 %vm1975_vm3, %v1368_v36  ;;  %v2302_v60 = vsel %vm1975_vm3, %v1674_v57, 0 }
 0x23b   : > { %3952 = vmatpush3.bf16.xpose.msra.mxu1 %v2118_v41  ;;  %3953 = vmatprep.mubr.msk.bf16.mxu1 %vm4415_vm2, %v4414_v3 }
 0x23c   : > { %3963 = vmatprep.subr.bf16.mxu1 %v4414_v3 }
 0x23d   : > { %3960 = vmatmul.mubr.msk.bf16.vlgmr.msra.gmra.mrb[16].mxu0 %vm1975_vm3, %v1371_v44 }
 0x23e   : > { %3970 = vmatpush3.bf16.xpose.msra.mxu0 %v2256_v45  ;;  %3971 = vmatprep.mubr.msk.bf16.mxu0 %vm4415_vm2, %v4414_v3 }
 0x23f   : > { %3981 = vmatprep.subr.bf16.mxu0 %v4414_v3 }
 0x242   : > { %3954 = vmatmul.mubr.msk.bf16.vlgmr.msra.gmra.mrb[8].mxu1 %vm1975_vm3, %v1370_v40 }
 0x243   : > { %3964 = vmatpush3.bf16.xpose.msra.mxu1 %v2210_v47  ;;  %3965 = vmatprep.mubr.msk.bf16.mxu1 %vm4415_vm2, %v4414_v3 }
 0x244   : > { %3975 = vmatprep.subr.bf16.mxu1 %v4414_v3 }
 0x245   : > { %3972 = vmatmul.mubr.msk.bf16.vlgmr.msra.gmra.mrb[20].mxu0 %vm1975_vm3, %v1373_v55 }
 0x246   : > { %3983 = vmatprep.mubr.msk.bf16.mxu0 %vm4415_vm2, %v4414_v3 }
 0x24a   : > { %3966 = vmatmul.mubr.msk.bf16.vlgmr.msra.gmra.mrb[12].mxu1 %vm1975_vm3, %v1372_v59 }
 0x24b   : > { %3976 = vmatpush3.bf16.xpose.msra.mxu1 %v2302_v60  ;;  %3977 = vmatprep.mubr.msk.bf16.mxu1 %vm4415_vm2, %v4414_v3 }
 0x24c   : > { %3987 = vmatprep.subr.bf16.mxu1 %v4414_v3 }
 0x252   : > { %3978 = vmatmul.mubr.msk.bf16.vlgmr.msra.gmra.mrb[16].mxu1 %vm1975_vm3, %v1374_v51 }
 0x253   : > { %3989 = vmatprep.mubr.msk.bf16.mxu1 %vm4415_vm2, %v4414_v3 }
 0x305   : > { %v2016_v62 = vpop.f32.mrb[0].mxu1 }
 0x306   : > { %v2345_v0 = vmul.f32 0.35355338, %v2016_v62  ;;  %v3937_v1 = vpop.f32.mrb[1].mxu1 }
 0x307   : > { %v2019_v54 = vpop.f32.mrb[2].mxu1 }
 0x308   : > { %v2108_v53 = vpop.f32.mrb[12].mxu0  ;;  %v3938_v6 = vpop.f32.mrb[3].mxu1  ;;  %v2360_v7 = vsel %vm4986_vm4, %v2345_v0, -1e+09 }
 0x309   : > { %v2347_v2 = vmul.f32 0.35355338, %v2108_v53  ;;  %v3949_v4 = vpop.f32.mrb[13].mxu0  ;;  %v2368_v9 = vsel %vm1975_vm3, %v2360_v7, -inf  ;;  %v1678_v0 = vpop.permute.xlu1 %1677 }
 0x30a   : > { %v2111_v8 = vpop.f32.mrb[14].mxu0  ;;  %2369 = vmax.xlane.f32.xlu0 %v2368_v9 }
 0x30b   : > { %v3950_v34 = vpop.f32.mrb[15].mxu0  ;;  %v2362_v38 = vsel %vm4986_vm4, %v2347_v2, -1e+09 }
 0x30c   : > { %v2374_v11 = vsel %vm1975_vm3, %v2362_v38, -inf }
 0x30d   : > { %v2062_v10 = vpop.f32.mrb[4].mxu1 }
 0x30e   : > { %v2346_v12 = vmul.f32 0.35355338, %v2062_v10  ;;  %v3943_v14 = vpop.f32.mrb[5].mxu1  ;;  %2375 = vmax.xlane.f32.xlu0 %v2374_v11 }
 0x30f   : > { %v2065_v15 = vpop.f32.mrb[6].mxu1 }
 0x310   : > { %v3944_v16 = vpop.f32.mrb[7].mxu1  ;;  %v2200_v17 = vpop.f32.mrb[16].mxu0  ;;  %v2361_v13 = vsel %vm4986_vm4, %v2346_v12, -1e+09 }
 0x311   : > { %v2349_v18 = vmul.f32 0.35355338, %v2200_v17  ;;  %v2371_v19 = vsel %vm1975_vm3, %v2361_v13, -inf  ;;  %v3961_v21 = vpop.f32.mrb[17].mxu0 }
 0x312   : > { %2372 = vmax.xlane.f32.xlu1 %v2371_v19  ;;  %v2203_v22 = vpop.f32.mrb[18].mxu0 }
 0x313   : > { %v3962_v23 = vpop.f32.mrb[19].mxu0  ;;  %v2364_v24 = vsel %vm4986_vm4, %v2349_v18, -1e+09 }
 0x314   : > { %v2380_v25 = vsel %vm1975_vm3, %v2364_v24, -inf }
 0x315   : > { %v2154_v20 = vpop.f32.mrb[8].mxu1 }
 0x316   : > { %v2348_v31 = vmul.f32 0.35355338, %v2154_v20  ;;  %v3955_v26 = vpop.f32.mrb[9].mxu1  ;;  %2381 = vmax.xlane.f32.xlu1 %v2380_v25 }
 0x317   : > { %v2157_v27 = vpop.f32.mrb[10].mxu1 }
 0x318   : > { %v3956_v28 = vpop.f32.mrb[11].mxu1  ;;  %v2292_v32 = vpop.f32.mrb[20].mxu0  ;;  %v2363_v33 = vsel %vm4986_vm4, %v2348_v31, -1e+09 }
 0x319   : > { %v2351_v35 = vmul.f32 0.35355338, %v2292_v32  ;;  %v2377_v36 = vsel %vm1975_vm3, %v2363_v33, -inf  ;;  %v3973_v37 = vpop.f32.mrb[21].mxu0 }
 0x31a   : > { %2378 = vmax.xlane.f32.xlu0 %v2377_v36  ;;  %v2295_v41 = vpop.f32.mrb[22].mxu0 }
 0x31b   : > { %v3974_v43 = vpop.f32.mrb[23].mxu0  ;;  %v5007_v44 = vsel %vm4986_vm4, %v2351_v35, -1e+09 }
 0x31c   : > { %v2386_v49 = vsel %vm1975_vm3, %v5007_v44, -inf }
 0x31d   : > { %v2246_v5 = vpop.f32.mrb[12].mxu1  ;;  %2387 = vmax.xlane.f32.xlu1 %v2386_v49 }
 0x31e   : > { %v2350_v30 = vmul.f32 0.35355338, %v2246_v5  ;;  %v3967_v45 = vpop.f32.mrb[13].mxu1 }
 0x31f   : > { %v2249_v46 = vpop.f32.mrb[14].mxu1 }
 0x320   : > { %v3968_v39 = vpop.f32.mrb[15].mxu1  ;;  %v5013_v40 = vsel %vm4986_vm4, %v2350_v30, -1e+09 }
 0x321   : > { %v2383_v47 = vsel %vm1975_vm3, %v5013_v40, -inf }
 0x322   : > { %2384 = vmax.xlane.f32.xlu0 %v2383_v47 }
 0x325   : > { %v2338_v48 = vpop.f32.mrb[16].mxu1 }
 0x326   : > { %v2352_v55 = vmul.f32 0.35355338, %v2338_v48  ;;  %v3979_v56 = vpop.f32.mrb[17].mxu1 }
 0x327   : > { %v2341_v57 = vpop.f32.mrb[18].mxu1 }
 0x328   : > { %v3980_v59 = vpop.f32.mrb[19].mxu1  ;;  %v5019_v60 = vsel %vm4986_vm4, %v2352_v55, -1e+09 }
 0x329   : > { %v2389_v61 = vsel %vm1975_vm3, %v5019_v60, -inf }
 0x32a   : > { %2390 = vmax.xlane.f32.xlu0 %v2389_v61 }
 0x32e   : > { %1689 = vrot.lane.b32.xlu1 %v4850_v58, %s4416_s15 }
 0x340   : > { %1683 = vrot.lane.b32.xlu0 %v4850_v58, %s4418_s18 }
 0x397   : > { %v2370_v51 = vpop.xlane.xlu0 %2369 }
 0x398   : > { %v2392_v52 = vsub.f32 %v2360_v7, %v2370_v51 }
 0x39a   : > { %v2400_v62 = vmul.f32 1.442695, %v2392_v52 }
 0x39b   : > { %v2376_v1 = vpop.xlane.xlu0 %2375 }
 0x39c   : > { %4189 = vpow2.f32 %v2400_v62  ;;  %v2394_v53 = vsub.f32 %v2362_v38, %v2376_v1 }
 0x39e   : > { %v2404_v63 = vmul.f32 1.442695, %v2394_v53 }
 0x39f   : > { %v2373_v54 = vpop.xlane.xlu1 %2372 }
 0x3a0   : > { %4191 = vpow2.f32 %v2404_v63  ;;  %v2393_v2 = vsub.f32 %v2361_v13, %v2373_v54 }
 0x3a2   : > { %v2402_v4 = vmul.f32 1.442695, %v2393_v2 }
 0x3a3   : > { %v2382_v6 = vpop.xlane.xlu1 %2381 }
 0x3a4   : > { %4193 = vpow2.f32 %v2402_v4  ;;  %v2396_v8 = vsub.f32 %v2364_v24, %v2382_v6 }
 0x3a6   : > { %v5027_v9 = vpop.eup %4189  ;;  %v2408_v34 = vmul.f32 1.442695, %v2396_v8 }
 0x3a7   : > { %v2379_v10 = vpop.xlane.xlu0 %2378  ;;  %v2416_v7 = vsel %vm1975_vm3, %v5027_v9, 0.0 }
 0x3a8   : > { %4195 = vpow2.f32 %v2408_v34  ;;  %v2395_v11 = vsub.f32 %v2363_v33, %v2379_v10  ;;  %2417 = vadd.xlane.f32.xlu1 %v2416_v7 }
 0x3aa   : > { %v5031_v12 = vpop.eup %4191  ;;  %v2406_v38 = vmul.f32 1.442695, %v2395_v11  ;;  %v2388_v17 = vpop.xlane.xlu1 %2387 }
 0x3ab   : > { %v2422_v14 = vsel %vm1975_vm3, %v5031_v12, 0.0 }
 0x3ac   : > { %4197 = vpow2.f32 %v2406_v38  ;;  %2423 = vadd.xlane.f32.xlu1 %v2422_v14 }
 0x3ae   : > { %v5035_v15 = vpop.eup %4193  ;;  %v1690_v22 = vpop.permute.xlu1 %1689 }
 0x3af   : > { %v2419_v16 = vsel %vm1975_vm3, %v5035_v15, 0.0  ;;  %v2385_v18 = vpop.xlane.xlu0 %2384  ;;  %v1711_v25 = vcombine.low %v1678_v0, %v1690_v22  ;;  %v1712_v20 = vcombine.high %v1678_v0, %v1690_v22 }
 0x3b0   : > { %2420 = vadd.xlane.f32.xlu0 %v2419_v16  ;;  %v2397_v63 = vsub.f32 %v5013_v40, %v2385_v18  ;;  %v2398_v40 = vsub.f32 %v5007_v44, %v2388_v17 }
 0x3b1   : > { %v1719_v28 = vrot.slane %v1711_v25, %v4833_v42  ;;  %v1726_v32 = vrot.slane %v1712_v20, %v4833_v42 }
 0x3b2   : > { %v5039_v13 = vpop.eup %4195  ;;  %v2410_v10 = vmul.f32 1.442695, %v2397_v63  ;;  %v2412_v38 = vmul.f32 1.442695, %v2398_v40 }
 0x3b3   : > { %v2428_v19 = vsel %vm1975_vm3, %v5039_v13, 0.0 }
 0x3b4   : > { %2429 = vadd.xlane.f32.xlu0 %v2428_v19  ;;  %4199 = vpow2.f32 %v2410_v10 }
 0x3b5   : > { %4201 = vpow2.f32 %v2412_v38 }
 0x3b6   : > { %v5043_v21 = vpop.eup %4197 }
 0x3b7   : > { %v5045_v23 = vpop.xlane.xlu0 %2390  ;;  %v2425_v24 = vsel %vm1975_vm3, %v5043_v21, 0.0 }
 0x3b8   : > { %2426 = vadd.xlane.f32.xlu0 %v2425_v24  ;;  %v2399_v44 = vsub.f32 %v5019_v60, %v5045_v23 }
 0x3ba   : > { %v2414_v17 = vmul.f32 1.442695, %v2399_v44 }
 0x3bb   : > { %v1684_v31 = vpop.permute.xlu0 %1683 }
 0x3bc   : > { %v1695_v26 = vcombine.low %v4850_v58, %v1684_v31  ;;  %v1696_v27 = vcombine.high %v4850_v58, %v1684_v31  ;;  %4203 = vpow2.f32 %v2414_v17 }
 0x3bd   : > { %1685 = vrot.lane.b32.xlu1 %v4953_v29, %s4418_s18 }
 0x3be   : > { %v1703_v33 = vrot.slane %v1695_v26, %v4833_v42  ;;  %v1710_v35 = vrot.slane %v1696_v27, %v4833_v42  ;;  %v5077_v14 = vpop.eup %4199 }
 0x3bf   : > { %v2431_v16 = vsel %vm1975_vm3, %v5077_v14, 0.0  ;;  %v5081_v18 = vpop.eup %4201 }
 0x3c0   : > { %v1727_v36 = vcombine.low %v1703_v33, %v1719_v28  ;;  %v1728_v37 = vcombine.high %v1703_v33, %v1719_v28  ;;  %v1743_v41 = vcombine.low %v1710_v35, %v1726_v32  ;;  %v1744_v43 = vcombine.high %v1710_v35, %v1726_v32 }
 0x3c1   : > { %v2434_v19 = vsel %vm1975_vm3, %v5081_v18, 0.0 }
 0x3c2   : > { %v1735_v49 = vrot.slane %v1727_v36, %v4843_v50  ;;  %v1742_v5 = vrot.slane %v1728_v37, %v4843_v50  ;;  %v1751_v58 = vrot.slane %v1743_v41, %v4843_v50  ;;  %v1758_v30 = vrot.slane %v1744_v43, %v4843_v50 }
 0x3c4   : > { %v1831_v45 = vcombine.low %v1735_v49, %v1742_v5  ;;  %v3798_v46 = vcombine.high %v1735_v49, %v1742_v5  ;;  %v1847_v39 = vcombine.low %v1751_v58, %v1758_v30  ;;  %v3799_v47 = vcombine.high %v1751_v58, %v1758_v30 }
 0x3c6   : > { %v1838_v48 = vrot.slane %v1831_v45, %v4833_v42  ;;  %v1846_v55 = vrot.slane %v3798_v46, %v4833_v42  ;;  %v1854_v56 = vrot.slane %v1847_v39, %v4833_v42  ;;  %v1862_v57 = vrot.slane %v3799_v47, %v4833_v42  ;;  %v5089_v22 = vpop.eup %4203 }
 0x3c7   : > { %v2437_v24 = vsel %vm1975_vm3, %v5089_v22, 0.0 }
 0x3c8   : > { %v1863_v59 = vcombine.low %v1838_v48, %v1846_v55  ;;  %v1879_v61 = vcombine.low %v1854_v56, %v1862_v57  ;;  %v1864_v51 = vcombine.high %v1838_v48, %v1846_v55  ;;  %v1880_v52 = vcombine.high %v1854_v56, %v1862_v57 }
 0x3ca   : > { %v1871_v62 = vrot.slane %v1863_v59, %v4843_v50  ;;  %v1887_v0 = vrot.slane %v1879_v61, %v4843_v50  ;;  %v1878_v1 = vrot.slane %v1864_v51, %v4843_v50  ;;  %v1894_v53 = vrot.slane %v1880_v52, %v4843_v50 }
 0x3cc   : > { %v1895_v54 = vcombine.low %v1871_v62, %v1887_v0  ;;  %v1896_v2 = vcombine.high %v1871_v62, %v1887_v0  ;;  %v1897_v4 = vcombine.low %v1878_v1, %v1894_v53  ;;  %v1898_v6 = vcombine.high %v1878_v1, %v1894_v53 }
 0x3ce   : > { %1679 = vrot.lane.b32.xlu0 %v4953_v29, %s4417_s17  ;;  %v1967_v8 = vpack.c.bf16 %v1895_v54, %v1895_v54  ;;  %v1968_v34 = vpack.c.bf16 %v1896_v2, %v1896_v2  ;;  %v1969_v32 = vpack.c.bf16 %v1897_v4, %v1897_v4  ;;  %v1970_v41 = vpack.c.bf16 %v1898_v6, %v1898_v6 }
 0x3d0   : > { %v2469_v7 = vsel %vm2467_vm5, %v1967_v8, 0  ;;  %v2515_v11 = vsel %vm2467_vm5, %v1968_v34, 0  ;;  %v2561_v35 = vsel %vm2467_vm5, %v1969_v32, 0  ;;  %v2607_v5 = vsel %vm2467_vm5, %v1970_v41, 0 }
 0x3d1   : > { %3982 = vmatpush3.bf16.msra.mxu0 %v2469_v7  ;;  %3988 = vmatpush3.bf16.msra.mxu1 %v2515_v11 }
 0x3d2   : > { %3993 = vmatprep.subr.bf16.mxu0 %v4414_v3  ;;  %3999 = vmatprep.subr.bf16.mxu1 %v4414_v3 }
 0x3e1   : > { %2432 = vadd.xlane.f32.xlu1 %v2431_v16 }
 0x3ed   : > { %2435 = vadd.xlane.f32.xlu0 %v2434_v19 }
 0x3f2   : > { %1691 = vrot.lane.b32.xlu1 %v4953_v29, %s4416_s15 }
 0x416   : > { %2438 = vadd.xlane.f32.xlu1 %v2437_v24 }
 0x435   : > { %v2418_v25 = vpop.xlane.xlu1 %2417 }
 0x436   : > { %4205 = vrcp.f32 %v2418_v25 }
 0x439   : > { %v2424_v20 = vpop.xlane.xlu1 %2423 }
 0x43a   : > { %4207 = vrcp.f32 %v2424_v20 }
 0x43d   : > { %v2421_v31 = vpop.xlane.xlu0 %2420  ;;  %v1686_v30 = vpop.permute.xlu1 %1685 }
 0x43e   : > { %4209 = vrcp.f32 %v2421_v31  ;;  %v1763_v46 = vcombine.low %v4953_v29, %v1686_v30  ;;  %v1764_v39 = vcombine.high %v4953_v29, %v1686_v30 }
 0x440   : > { %v4206_v26 = vpop.eup %4205  ;;  %v1771_v57 = vrot.slane %v1763_v46, %v4833_v42 }
 0x441   : > { %v2441_v27 = vmul.f32 %v4206_v26, %v5027_v9  ;;  %v2430_v28 = vpop.xlane.xlu0 %2429 }
 0x443   : > { %v2456_v60 = vpack.c.bf16 %v2441_v27, %v2441_v27 }
 0x444   : > { %v4208_v23 = vpop.eup %4207 }
 0x445   : > { %v2427_v33 = vpop.xlane.xlu0 %2426  ;;  %3984 = vmatmul.mubr.msk.bf16.vlgmr.msra.gmra.mrb[24].mxu0 %vm1975_vm3, %v2456_v60  ;;  %v2445_v36 = vmul.f32 %v4208_v23, %v5031_v12 }
 0x446   : > { %4211 = vrcp.f32 %v2427_v33  ;;  %3994 = vmatpush3.bf16.msra.mxu0 %v2561_v35  ;;  %3995 = vmatprep.mubr.msk.bf16.mxu0 %vm4415_vm2, %v4414_v3 }
 0x447   : > { %4005 = vmatprep.subr.bf16.mxu0 %v4414_v3  ;;  %v2458_v49 = vpack.c.bf16 %v2445_v36, %v2445_v36  ;;  %4213 = vrcp.f32 %v2430_v28 }
 0x448   : > { %v4210_v37 = vpop.eup %4209 }
 0x449   : > { %v2443_v9 = vmul.f32 %v4210_v37, %v5035_v15  ;;  %v1680_v47 = vpop.permute.xlu0 %1679 }
 0x44b   : > { %v2457_v43 = vpack.c.bf16 %v2443_v9, %v2443_v9 }
 0x44d   : > { %3990 = vmatmul.mubr.msk.bf16.vlgmr.msra.gmra.mrb[20].mxu1 %vm1975_vm3, %v2457_v43  ;;  %3996 = vmatmul.mubr.msk.bf16.vlgmr.msra.gmra.mrb[28].mxu0 %vm1975_vm3, %v2458_v49 }
 0x44e   : > { %4000 = vmatpush3.bf16.msra.mxu1 %v2607_v5  ;;  %4001 = vmatprep.mubr.msk.bf16.mxu1 %vm4415_vm2, %v4414_v3 }
 0x44f   : > { %4011 = vmatprep.subr.bf16.mxu1 %v4414_v3  ;;  %4007 = vmatprep.mubr.msk.bf16.mxu0 %vm4415_vm2, %v4414_v3 }
 0x450   : > { %v4212_v12 = vpop.eup %4211 }
 0x451   : > { %v2447_v15 = vmul.f32 %v4212_v12, %v5043_v21  ;;  %v1778_v21 = vrot.slane %v1764_v39, %v4833_v42  ;;  %v4214_v44 = vpop.eup %4213 }
 0x452   : > { %v2449_v60 = vmul.f32 %v4214_v44, %v5039_v13 }
 0x453   : > { %v2459_v58 = vpack.c.bf16 %v2447_v15, %v2447_v15 }
 0x454   : > { %v2460_v43 = vpack.c.bf16 %v2449_v60, %v2449_v60 }
 0x455   : > { %4002 = vmatmul.mubr.msk.bf16.vlgmr.msra.gmra.mrb[24].mxu1 %vm1975_vm3, %v2459_v58 }
 0x456   : > { %4013 = vmatprep.mubr.msk.bf16.mxu1 %vm4415_vm2, %v4414_v3 }
 0x46e   : > { %v2433_v45 = vpop.xlane.xlu1 %2432 }
 0x46f   : > { %4215 = vrcp.f32 %v2433_v45 }
 0x472   : > { %v1692_v48 = vpop.permute.xlu1 %1691 }
 0x473   : > { %v1779_v55 = vcombine.low %v1680_v47, %v1692_v48  ;;  %v1780_v56 = vcombine.high %v1680_v47, %v1692_v48 }
 0x475   : > { %v1787_v59 = vrot.slane %v1779_v55, %v4833_v42  ;;  %v1794_v61 = vrot.slane %v1780_v56, %v4833_v42  ;;  %v4177_v55 = vld [vmem:[%s5422_s22] sm:$0xff]  }
 0x477   : > { %v1795_v51 = vcombine.low %v1771_v57, %v1787_v59  ;;  %v1796_v52 = vcombine.high %v1771_v57, %v1787_v59  ;;  %v1811_v62 = vcombine.low %v1778_v21, %v1794_v61  ;;  %v1812_v0 = vcombine.high %v1778_v21, %v1794_v61 }
 0x479   : > { %v1803_v29 = vrot.slane %v1795_v51, %v4843_v50  ;;  %v1810_v1 = vrot.slane %v1796_v52, %v4843_v50  ;;  %v1819_v53 = vrot.slane %v1811_v62, %v4843_v50  ;;  %v1826_v63 = vrot.slane %v1812_v0, %v4843_v50  ;;  %v4216_v31 = vpop.eup %4215 }
 0x47a   : > { %v2436_v11 = vpop.xlane.xlu0 %2435  ;;  %v2451_v23 = vmul.f32 %v4216_v31, %v5077_v14  ;;  %v3163_v52 = vsel %vm888_vm1, %v4177_v55, 0 }
 0x47b   : > { %v1899_v54 = vcombine.low %v1803_v29, %v1810_v1  ;;  %v3800_v2 = vcombine.high %v1803_v29, %v1810_v1  ;;  %v1915_v4 = vcombine.low %v1819_v53, %v1826_v63  ;;  %v3801_v6 = vcombine.high %v1819_v53, %v1826_v63 }
 0x47c   : > { %4217 = vrcp.f32 %v2436_v11  ;;  %v2461_v49 = vpack.c.bf16 %v2451_v23, %v2451_v23 }
 0x47d   : > { %v1906_v8 = vrot.slane %v1899_v54, %v4833_v42  ;;  %v1914_v34 = vrot.slane %v3800_v2, %v4833_v42  ;;  %v1922_v10 = vrot.slane %v1915_v4, %v4833_v42  ;;  %v1930_v7 = vrot.slane %v3801_v6, %v4833_v42 }
 0x47f   : > { %v1931_v40 = vcombine.low %v1906_v8, %v1914_v34  ;;  %v1947_v38 = vcombine.low %v1922_v10, %v1930_v7  ;;  %v1932_v16 = vcombine.high %v1906_v8, %v1914_v34  ;;  %v1948_v19 = vcombine.high %v1922_v10, %v1930_v7 }
 0x481   : > { %v1939_v17 = vrot.slane %v1931_v40, %v4843_v50  ;;  %v1955_v24 = vrot.slane %v1947_v38, %v4843_v50  ;;  %v1946_v25 = vrot.slane %v1932_v16, %v4843_v50  ;;  %v1962_v20 = vrot.slane %v1948_v19, %v4843_v50 }
 0x483   : > { %v1963_v26 = vcombine.low %v1939_v17, %v1955_v24  ;;  %v1964_v27 = vcombine.high %v1939_v17, %v1955_v24  ;;  %v1965_v28 = vcombine.low %v1946_v25, %v1962_v20  ;;  %v1966_v32 = vcombine.high %v1946_v25, %v1962_v20 }
 0x485   : > { %v1971_v33 = vpack.c.bf16 %v1963_v26, %v1963_v26  ;;  %v1972_v35 = vpack.c.bf16 %v1964_v27, %v1964_v27  ;;  %v1973_v9 = vpack.c.bf16 %v1965_v28, %v1965_v28  ;;  %v1974_v41 = vpack.c.bf16 %v1966_v32, %v1966_v32 }
 0x486   : > { %v4218_v5 = vpop.eup %4217 }
 0x487   : > { %v2653_v36 = vsel %vm2467_vm5, %v1971_v33, 0  ;;  %v2699_v37 = vsel %vm2467_vm5, %v1972_v35, 0  ;;  %v2745_v13 = vsel %vm2467_vm5, %v1973_v9, 0  ;;  %v2791_v14 = vsel %vm2467_vm5, %v1974_v41, 0 }
 0x488   : > { %4006 = vmatpush3.bf16.msra.mxu0 %v2653_v36  ;;  %4012 = vmatpush3.bf16.msra.mxu1 %v2699_v37  ;;  %v2453_v12 = vmul.f32 %v4218_v5, %v5081_v18 }
 0x489   : > { %4017 = vmatprep.subr.bf16.mxu0 %v4414_v3  ;;  %4023 = vmatprep.subr.bf16.mxu1 %v4414_v3 }
 0x48a   : > { %v2462_v15 = vpack.c.bf16 %v2453_v12, %v2453_v12 }
 0x48b   : > { %4008 = vmatmul.mubr.msk.bf16.vlgmr.msra.gmra.mrb[32].mxu0 %vm1975_vm3, %v2460_v43  ;;  %4014 = vmatmul.mubr.msk.bf16.vlgmr.msra.gmra.mrb[28].mxu1 %vm1975_vm3, %v2461_v49 }
 0x48c   : > { %4018 = vmatpush3.bf16.msra.mxu0 %v2745_v13  ;;  %4024 = vmatpush3.bf16.msra.mxu1 %v2791_v14 }
 0x48d   : > { %4019 = vmatprep.mubr.msk.bf16.mxu0 %vm4415_vm2, %v4414_v3  ;;  %4025 = vmatprep.mubr.msk.bf16.mxu1 %vm4415_vm2, %v4414_v3 }
 0x48e   : > { %4029 = vmatprep.subr.bf16.mxu0 %v4414_v3  ;;  %4037 = vmatprep.subr.bf16.mxu1 %v4414_v3 }
 0x493   : > { %4020 = vmatmul.mubr.msk.bf16.vlgmr.msra.gmra.mrb[36].mxu0 %vm1975_vm3, %v2462_v15 }
 0x494   : > { %4033 = vmatprep.mubr.msk.bf16.mxu0 %vm4415_vm2, %v4414_v3 }
 0x495   : > { %4030 = vmatpush3.bf16.xpose.msra.mxu0 %v3163_v52 }
 0x496   : > { %4031 = vmatprep.subr.bf16.mxu0 %v4414_v3 }
 0x4a3   : > { %v2439_v58 = vpop.xlane.xlu1 %2438 }
 0x4a4   : > { %4219 = vrcp.f32 %v2439_v58 }
 0x4ae   : > { %v4220_v18 = vpop.eup %4219 }
 0x4af   : > { %v2455_v30 = vmul.f32 %v4220_v18, %v5089_v22 }
 0x4b1   : > { %v2463_v45 = vpack.c.bf16 %v2455_v30, %v2455_v30 }
 0x4b3   : > { %4026 = vmatmul.mubr.msk.bf16.vlgmr.msra.gmra.mrb[32].mxu1 %vm1975_vm3, %v2463_v45 }
 0x4b4   : > { %4053 = vmatprep.mubr.msk.bf16.mxu1 %vm4415_vm2, %v4414_v3 }
 0x518   : > { %v2505_v46 = vpop.f32.mrb[24].mxu0 }
 0x519   : > { %v3985_v39 = vpop.f32.mrb[25].mxu0 }
 0x51a   : > { %v2508_v47 = vpop.f32.mrb[26].mxu0 }
 0x51b   : > { %v3986_v48 = vpop.f32.mrb[27].mxu0 }
 0x520   : > { %v2551_v56 = vpop.f32.mrb[20].mxu1  ;;  %v2597_v57 = vpop.f32.mrb[28].mxu0 }
 0x521   : > { %v2833_v21 = vcombine.low %v2505_v46, %v2597_v57  ;;  %v2834_v59 = vcombine.high %v2505_v46, %v2597_v57  ;;  %v3991_v61 = vpop.f32.mrb[21].mxu1  ;;  %v3997_v51 = vpop.f32.mrb[29].mxu0 }
 0x522   : > { %v2554_v22 = vpop.f32.mrb[22].mxu1  ;;  %v2600_v62 = vpop.f32.mrb[30].mxu0 }
 0x523   : > { %v3992_v0 = vpop.f32.mrb[23].mxu1  ;;  %v3998_v29 = vpop.f32.mrb[31].mxu0  ;;  %v2841_v4 = vrot.slane %v2833_v21, %v4833_v42  ;;  %v2848_v6 = vrot.slane %v2834_v59, %v4833_v42 }
 0x528   : > { %v2643_v1 = vpop.f32.mrb[24].mxu1 }
 0x529   : > { %v2849_v53 = vcombine.low %v2551_v56, %v2643_v1  ;;  %v2850_v63 = vcombine.high %v2551_v56, %v2643_v1  ;;  %v4003_v54 = vpop.f32.mrb[25].mxu1 }
 0x52a   : > { %v2646_v2 = vpop.f32.mrb[26].mxu1 }
 0x52b   : > { %v2857_v8 = vrot.slane %v2849_v53, %v4833_v42  ;;  %v2864_v34 = vrot.slane %v2850_v63, %v4833_v42  ;;  %v4004_v10 = vpop.f32.mrb[27].mxu1 }
 0x52d   : > { %v2865_v7 = vcombine.low %v2841_v4, %v2857_v8  ;;  %v2866_v11 = vcombine.high %v2841_v4, %v2857_v8  ;;  %v2881_v40 = vcombine.low %v2848_v6, %v2864_v34  ;;  %v2882_v38 = vcombine.high %v2848_v6, %v2864_v34 }
 0x52f   : > { %v2873_v16 = vrot.slane %v2865_v7, %v4843_v50  ;;  %v2880_v19 = vrot.slane %v2866_v11, %v4843_v50  ;;  %v2889_v44 = vrot.slane %v2881_v40, %v4843_v50  ;;  %v2896_v17 = vrot.slane %v2882_v38, %v4843_v50  ;;  %v4178_v38 = vld [vmem:[%s5422_s22 + $0x8] sm:$0xff]  }
 0x531   : > { %v2969_v24 = vcombine.low %v2873_v16, %v2880_v19  ;;  %v3818_v25 = vcombine.high %v2873_v16, %v2880_v19  ;;  %v2985_v20 = vcombine.low %v2889_v44, %v2896_v17  ;;  %v3819_v31 = vcombine.high %v2889_v44, %v2896_v17 }
 0x533   : > { %v2976_v26 = vrot.slane %v2969_v24, %v4833_v42  ;;  %v2984_v27 = vrot.slane %v3818_v25, %v4833_v42  ;;  %v2992_v28 = vrot.slane %v2985_v20, %v4833_v42  ;;  %v3000_v32 = vrot.slane %v3819_v31, %v4833_v42 }
 0x534   : > { %v3166_v24 = vsel %vm888_vm1, %v4178_v38, 0 }
 0x535   : > { %v3002_v60 = vcombine.high %v2976_v26, %v2984_v27  ;;  %v3018_v23 = vcombine.high %v2992_v28, %v3000_v32  ;;  %v3001_v33 = vcombine.low %v2976_v26, %v2984_v27  ;;  %v3017_v35 = vcombine.low %v2992_v28, %v3000_v32  ;;  %4032 = vmatpush3.bf16.xpose.msra.mxu0 %v3166_v24  ;;  %v4185_v24 = vld [vmem:[%s5423_s13 + $0x30] sm:$0xff]  }
 0x536   : > { %4057 = vmatprep.subr.bf16.mxu0 %v4414_v3 }
 0x537   : > { %v5171_v36 = vrot.slane %v3002_v60, %v4843_v50  ;;  %v5174_v37 = vrot.slane %v3018_v23, %v4843_v50  ;;  %v5177_v9 = vrot.slane %v3001_v33, %v4843_v50  ;;  %v5180_v41 = vrot.slane %v3017_v35, %v4843_v50 }
 0x539   : > { %v3035_v43 = vcombine.low %v5171_v36, %v5174_v37  ;;  %v3033_v49 = vcombine.low %v5177_v9, %v5180_v41  ;;  %v3034_v5 = vcombine.high %v5177_v9, %v5180_v41  ;;  %v3036_v13 = vcombine.high %v5171_v36, %v5174_v37  ;;  %v3822_v9 = vld [vmem:[%s5425_s2] ss:$0 sm:$0xff] }
 0x55e   : > { %v2689_v14 = vpop.f32.mrb[32].mxu0  ;;  %v2735_v12 = vpop.f32.mrb[28].mxu1 }
 0x55f   : > { %v4009_v15 = vpop.f32.mrb[33].mxu0  ;;  %v4015_v58 = vpop.f32.mrb[29].mxu1 }
 0x560   : > { %v2692_v18 = vpop.f32.mrb[34].mxu0  ;;  %v2738_v30 = vpop.f32.mrb[30].mxu1 }
 0x561   : > { %v4010_v45 = vpop.f32.mrb[35].mxu0  ;;  %v4016_v46 = vpop.f32.mrb[31].mxu1 }
 0x566   : > { %v2781_v39 = vpop.f32.mrb[36].mxu0 }
 0x567   : > { %v2901_v47 = vcombine.low %v2689_v14, %v2781_v39  ;;  %v2902_v48 = vcombine.high %v2689_v14, %v2781_v39  ;;  %v4021_v55 = vpop.f32.mrb[37].mxu0 }
 0x568   : > { %v2784_v56 = vpop.f32.mrb[38].mxu0 }
 0x569   : > { %v4022_v57 = vpop.f32.mrb[39].mxu0  ;;  %v2909_v22 = vrot.slane %v2901_v47, %v4833_v42  ;;  %v2916_v62 = vrot.slane %v2902_v48, %v4833_v42 }
 0x586   : > { %v2827_v21 = vpop.f32.mrb[32].mxu1 }
 0x587   : > { %v2917_v59 = vcombine.low %v2735_v12, %v2827_v21  ;;  %v2918_v61 = vcombine.high %v2735_v12, %v2827_v21  ;;  %v4027_v51 = vpop.f32.mrb[33].mxu1 }
 0x588   : > { %v2830_v52 = vpop.f32.mrb[34].mxu1 }
 0x589   : > { %v2925_v0 = vrot.slane %v2917_v59, %v4833_v42  ;;  %v2932_v29 = vrot.slane %v2918_v61, %v4833_v42  ;;  %v4028_v1 = vpop.f32.mrb[35].mxu1 }
 0x58a   : > { %v4181_v1 = vld [vmem:[%s5423_s13 + $0x10] sm:$0xff]  }
 0x58b   : > { %v2933_v53 = vcombine.low %v2909_v22, %v2925_v0  ;;  %v2934_v63 = vcombine.high %v2909_v22, %v2925_v0  ;;  %v2949_v54 = vcombine.low %v2916_v62, %v2932_v29  ;;  %v2950_v2 = vcombine.high %v2916_v62, %v2932_v29  ;;  %v4179_v22 = vld [vmem:[%s5423_s13] sm:$0xff]   ;;  %v4180_v0 = vld [vmem:[%s5423_s13 + $0x8] sm:$0xff]  }
 0x58c   : > { %v3324_v62 = vsel %vm888_vm1, %v4179_v22, 0  ;;  %v3327_v29 = vsel %vm888_vm1, %v4180_v0, 0 }
 0x58d   : > { %v2941_v4 = vrot.slane %v2933_v53, %v4843_v50  ;;  %v2948_v6 = vrot.slane %v2934_v63, %v4843_v50  ;;  %v2957_v8 = vrot.slane %v2949_v54, %v4843_v50  ;;  %v2964_v34 = vrot.slane %v2950_v2, %v4843_v50  ;;  %4038 = vmatpush3.bf16.xpose.msra.mxu1 %v3324_v62  ;;  %v4182_v63 = vld [vmem:[%s5423_s13 + $0x18] sm:$0xff]   ;;  %v4183_v2 = vld [vmem:[%s5423_s13 + $0x20] sm:$0xff]  }
 0x58e   : > { %4039 = vmatprep.subr.bf16.mxu1 %v4414_v3  ;;  %v3330_v53 = vsel %vm888_vm1, %v4181_v1, 0  ;;  %v3333_v54 = vsel %vm888_vm1, %v4182_v63, 0 }
 0x58f   : > { %v3037_v10 = vcombine.low %v2941_v4, %v2948_v6  ;;  %v3820_v7 = vcombine.high %v2941_v4, %v2948_v6  ;;  %v3053_v11 = vcombine.low %v2957_v8, %v2964_v34  ;;  %v3821_v40 = vcombine.high %v2957_v8, %v2964_v34 }
 0x590   : > { %v3336_v4 = vsel %vm888_vm1, %v4183_v2, 0 }
 0x591   : > { %v3044_v16 = vrot.slane %v3037_v10, %v4833_v42  ;;  %v3052_v19 = vrot.slane %v3820_v7, %v4833_v42  ;;  %v3060_v44 = vrot.slane %v3053_v11, %v4833_v42  ;;  %v3068_v17 = vrot.slane %v3821_v40, %v4833_v42 }
 0x593   : > { %v3070_v25 = vcombine.high %v3044_v16, %v3052_v19  ;;  %v3086_v20 = vcombine.high %v3060_v44, %v3068_v17  ;;  %v3069_v31 = vcombine.low %v3044_v16, %v3052_v19  ;;  %v3085_v26 = vcombine.low %v3060_v44, %v3068_v17  ;;  %v4184_v44 = vld [vmem:[%s5423_s13 + $0x28] sm:$0xff]  }
 0x594   : > { %v3339_v17 = vsel %vm888_vm1, %v4184_v44, 0 }
 0x595   : > { %v3084_v27 = vrot.slane %v3070_v25, %v4843_v50  ;;  %v3100_v28 = vrot.slane %v3086_v20, %v4843_v50  ;;  %v3077_v32 = vrot.slane %v3069_v31, %v4843_v50  ;;  %v3093_v60 = vrot.slane %v3085_v26, %v4843_v50  ;;  %4040 = vmatpush3.bf16.xpose.msra.mxu1 %v3327_v29  ;;  %v4186_v20 = vld [vmem:[%s5423_s13 + $0x38] sm:$0xff]   ;;  %v3838_v29 = vld [vmem:[%s846_s0] ss:$0 sm:$0xff]  ;;  %s5428_s0 = sld [smem:[#allocation18_spill]] }
 0x596   : > { %4041 = vmatprep.subr.bf16.mxu1 %v4414_v3  ;;  %v3342_v25 = vsel %vm888_vm1, %v4185_v24, 0  ;;  %v3345_v31 = vsel %vm888_vm1, %v4186_v20, 0 }
 0x597   : > { %v3103_v23 = vcombine.low %v3084_v27, %v3100_v28  ;;  %v3102_v33 = vcombine.high %v3077_v32, %v3093_v60  ;;  %v3101_v42 = vcombine.low %v3077_v32, %v3093_v60  ;;  %v3104_v35 = vcombine.high %v3084_v27, %v3100_v28 }
 0x599   : > { %v4161_v36 = vpack.i.bf16 %v3103_v23, %v3035_v43  ;;  %v4156_v37 = vpack.i.bf16 %v3102_v33, %v3034_v5  ;;  %v4166_v14 = vpack.i.bf16 %v3104_v35, %v3036_v13 }
 0x59b   : > { %4162 = vrot.lane.b32.xlu1 %v4161_v36, %s4421_s19  ;;  %4157 = vrot.lane.b32.xlu0 %v4156_v37, %s4422_s26  ;;  %v3827_v37 = vld [vmem:[%s4763_s20] ss:$0 sm:$0xff]  ;;  %p4091_p0 = scmp.eq.s32.totalorder %s5428_s0, 1 }
 0x59d   : > { %4042 = vmatpush3.bf16.xpose.msra.mxu1 %v3330_v53  ;;  %p4325_p1 = pnand %p4324_p6, %p4091_p0 }
 0x59e   : > { %4043 = vmatprep.subr.bf16.mxu1 %v4414_v3 }
 0x59f   : > { %4167 = vrot.lane.b32.xlu0 %v4166_v14, %s4423_s29  ;;  %p4326_p4 = pneg %p4325_p1 }
 0x5a1   : > { %p4333_p12 = pnand %p4332_p10, %p4326_p4 }
 0x5a5   : > { %4044 = vmatpush3.bf16.xpose.msra.mxu1 %v3333_v54 }
 0x5a6   : > { %4045 = vmatprep.subr.bf16.mxu1 %v4414_v3 }
 0x5ad   : > { %4046 = vmatpush3.bf16.xpose.msra.mxu1 %v3336_v4 }
 0x5ae   : > { %4047 = vmatprep.subr.bf16.mxu1 %v4414_v3 }
 0x5b5   : > { %4048 = vmatpush3.bf16.xpose.msra.mxu1 %v3339_v17 }
 0x5b6   : > { %4049 = vmatprep.subr.bf16.mxu1 %v4414_v3 }
 0x5bd   : > { %4050 = vmatpush3.bf16.xpose.msra.mxu1 %v3342_v25 }
 0x5be   : > { %4051 = vmatprep.subr.bf16.mxu1 %v4414_v3 }
 0x5c5   : > { %4052 = vmatpush3.bf16.xpose.msra.mxu1 %v3345_v31 }
 0x60d   : > { %v4163_v12 = vpop.permute.xlu1 %4162  ;;  %v4158_v15 = vpop.permute.xlu0 %4157 }
 0x60e   : > { %v4160_v58 = vunpack.i.h.bf16 %v4158_v15  ;;  %v4159_v18 = vunpack.i.l.bf16 %v4158_v15  ;;  %v4165_v30 = vunpack.i.h.bf16 %v4163_v12  ;;  %v4164_v50 = vunpack.i.l.bf16 %v4163_v12 }
 0x610   : > { %v3129_v43 = vsel %vm1975_vm3, %v3033_v49, %v4159_v18  ;;  %v3130_v5 = vsel %vm1975_vm3, %v3101_v42, %v4160_v58  ;;  %v3826_v42 = vld [vmem:[%s5426_s7] ss:$0 sm:$0xff] }
 0x611   : > { %v4168_v13 = vpop.permute.xlu0 %4167  ;;  %v3132_v39 = vsel %vm3131_vm6, %v3129_v43, %v4164_v50  ;;  %v3133_v47 = vsel %vm3131_vm6, %v3130_v5, %v4165_v30  ;;  %v4233_v30 = vld [vmem:[#allocation8] sm:$0xff]  ;;  %v4234_v43 = vld [vmem:[#allocation8 + $0x8] sm:$0xff] }
 0x612   : > { %v4170_v45 = vunpack.i.h.bf16 %v4168_v13  ;;  %v4169_v46 = vunpack.i.l.bf16 %v4168_v13 }
 0x614   : > { %v3135_v48 = vsel %vm3134_vm7, %v3132_v39, %v4169_v46  ;;  %v3136_v55 = vsel %vm3134_vm7, %v3133_v47, %v4170_v45  ;;  %v4187_v45 = vld [vmem:[%s4749_s28] sm:$0xff]   ;;  %v4188_v46 = vld [vmem:[%s4749_s28 + $0x8] sm:$0xff]  }
 0x615   : > { %v3137_v56 = vpack.c.bf16 %v3136_v55, %v3135_v48  ;;  %v3828_v39 = vld [vmem:[%s838_s16] ss:$0 sm:$0xff] }
 0x617   : > { %4034 = vmatmul.mubr.msk.bf16.vlgmr.msra.gmra.mrb[40].mxu0 %vm888_vm1, %v3137_v56 }
 0x618   : > { %4061 = vmatprep.mubr.msk.bf16.mxu0 %vm4415_vm2, %v4414_v3  ;;  %4058 = vmatpush3.bf16.xpose.msra.mxu0 %v4187_v45 }
 0x619   : > { %4059 = vmatprep.subr.bf16.mxu0 %v4414_v3 }
 0x620   : > { %4060 = vmatpush3.bf16.xpose.msra.mxu0 %v4188_v46 }
 0x6ea   : > { %v3202_v41 = vpop.f32.mrb[40].mxu0 }
 0x6eb   : > { %v3203_v49 = vadd.f32 %v3822_v9, %v3202_v41  ;;  %v4035_v57 = vpop.f32.mrb[41].mxu0 }
 0x6ec   : > { %v3205_v21 = vpop.f32.mrb[42].mxu0 }
 0x6ed   : > { %v3206_v59 = vadd.f32 %v3822_v9, %v3205_v21  ;;  %v4036_v61 = vpop.f32.mrb[43].mxu0  ;;  %v3211_v51 = vsel %vm888_vm1, %v3203_v49, 0.0 }
 0x6ee   : > { %3212 = vadd.xlane.f32.xlu1 %v3211_v51 }
 0x6ef   : > { %v3214_v52 = vsel %vm888_vm1, %v3206_v59, 0.0 }
 0x6f0   : > { %3215 = vadd.xlane.f32.xlu0 %v3214_v52 }
 0x77b   : > { %v3213_v6 = vpop.xlane.xlu1 %3212 }
 0x77c   : > { %v3218_v8 = vmul.f32 0.03125, %v3213_v6 }
 0x77d   : > { %v3216_v34 = vpop.xlane.xlu0 %3215 }
 0x77e   : > { %v3220_v10 = vsub.f32 %v3203_v49, %v3218_v8  ;;  %v3219_v7 = vmul.f32 0.03125, %v3216_v34 }
 0x780   : > { %v3221_v11 = vsub.f32 %v3206_v59, %v3219_v7  ;;  %v3222_v40 = vmul.f32 %v3220_v10, %v3220_v10 }
 0x782   : > { %v3224_v38 = vsel %vm888_vm1, %v3222_v40, 0.0  ;;  %v3223_v16 = vmul.f32 %v3221_v11, %v3221_v11 }
 0x783   : > { %3225 = vadd.xlane.f32.xlu0 %v3224_v38 }
 0x784   : > { %v3227_v19 = vsel %vm888_vm1, %v3223_v16, 0.0 }
 0x785   : > { %3228 = vadd.xlane.f32.xlu1 %v3227_v19 }
 0x810   : > { %v3226_v26 = vpop.xlane.xlu0 %3225 }
 0x811   : > { %v3230_v27 = vmul.f32 0.03125, %v3226_v26 }
 0x812   : > { %v3229_v28 = vpop.xlane.xlu1 %3228 }
 0x813   : > { %v3232_v32 = vadd.f32 1e-05, %v3230_v27  ;;  %v3231_v60 = vmul.f32 0.03125, %v3229_v28 }
 0x815   : > { %4221 = vrsqrt.f32 %v3232_v32  ;;  %v3233_v23 = vadd.f32 1e-05, %v3231_v60  ;;  %v3841_v32 = vld [vmem:[%s849_s9] ss:$0 sm:$0xff] }
 0x817   : > { %4223 = vrsqrt.f32 %v3233_v23 }
 0x81f   : > { %v4222_v33 = vpop.eup %4221 }
 0x820   : > { %v3236_v35 = vmul.f32 %v4222_v33, %v3220_v10  ;;  %v3842_v33 = vld [vmem:[%s852_s11] ss:$0 sm:$0xff] }
 0x821   : > { %v4224_v36 = vpop.eup %4223 }
 0x822   : > { %v3244_v14 = vmul.f32 %v3826_v42, %v3236_v35  ;;  %v3237_v12 = vmul.f32 %v4224_v36, %v3221_v11 }
 0x824   : > { %v3245_v15 = vmul.f32 %v3826_v42, %v3237_v12  ;;  %v3252_v58 = vadd.f32 %v3827_v37, %v3244_v14 }
 0x826   : > { %v3253_v18 = vadd.f32 %v3827_v37, %v3245_v15  ;;  %v5252_v50 = vadd.f32 %v4233_v30, %v3252_v58 }
 0x828   : > { %v5254_v5 = vadd.f32 %v4234_v43, %v3253_v18 }
 0x82a   : > { %v3256_v13 = vpack.c.bf16 %v5254_v5, %v5252_v50 }
 0x82c   : > { %4054 = vmatmul.mubr.msk.bf16.vlgmr.msra.gmra.mrb[36].mxu1 %vm888_vm1, %v3256_v13 }
 0x8ff   : > { %v3381_v47 = vpop.f32.mrb[36].mxu1 }
 0x900   : > { %v3382_v48 = vadd.f32 %v3828_v39, %v3381_v47  ;;  %v4055_v55 = vpop.f32.mrb[37].mxu1 }
 0x901   : > { %v3384_v56 = vpop.f32.mrb[38].mxu1 }
 0x902   : > { %v3391_v9 = vmul.f32 0.70710677, %v3382_v48  ;;  %v3385_v41 = vadd.f32 %v3828_v39, %v3384_v56  ;;  %v4056_v49 = vpop.f32.mrb[39].mxu1  ;;  %v3388_v61 = vmul.f32 0.5, %v3382_v48 }
 0x904   : > { %4225 = verf.f32 %v3391_v9  ;;  %v3392_v57 = vmul.f32 0.70710677, %v3385_v41  ;;  %v3389_v51 = vmul.f32 0.5, %v3385_v41 }
 0x906   : > { %4227 = verf.f32 %v3392_v57 }
 0x90e   : > { %v4226_v21 = vpop.eup %4225 }
 0x90f   : > { %v3395_v3 = vadd.f32 1.0, %v4226_v21 }
 0x910   : > { %v4228_v59 = vpop.eup %4227 }
 0x911   : > { %v3396_v52 = vadd.f32 1.0, %v4228_v59  ;;  %v3397_v22 = vmul.f32 %v3395_v3, %v3388_v61 }
 0x913   : > { %v3398_v62 = vmul.f32 %v3396_v52, %v3389_v51 }
 0x915   : > { %v3399_v0 = vpack.c.bf16 %v3398_v62, %v3397_v22 }
 0x917   : > { %4062 = vmatmul.mubr.bf16.vlgmr.msra.gmra.mrb[44].mxu0 %v3399_v0 }
 0x9ea   : > { %v3457_v1 = vpop.f32.mrb[44].mxu0 }
 0x9eb   : > { %v3458_v53 = vadd.f32 %v3838_v29, %v3457_v1  ;;  %v4063_v63 = vpop.f32.mrb[45].mxu0 }
 0x9ec   : > { %v3460_v54 = vpop.f32.mrb[46].mxu0 }
 0x9ed   : > { %v3461_v2 = vadd.f32 %v3838_v29, %v3460_v54  ;;  %v4064_v4 = vpop.f32.mrb[47].mxu0  ;;  %v3466_v6 = vsel %vm888_vm1, %v3458_v53, 0.0 }
 0x9ee   : > { %3467 = vadd.xlane.f32.xlu0 %v3466_v6 }
 0x9ef   : > { %v3469_v8 = vsel %vm888_vm1, %v3461_v2, 0.0 }
 0x9f0   : > { %3470 = vadd.xlane.f32.xlu1 %v3469_v8 }
 0xa7b   : > { %v3468_v34 = vpop.xlane.xlu0 %3467 }
 0xa7c   : > { %v3472_v10 = vmul.f32 0.03125, %v3468_v34 }
 0xa7d   : > { %v3471_v7 = vpop.xlane.xlu1 %3470 }
 0xa7e   : > { %v3474_v11 = vsub.f32 %v3458_v53, %v3472_v10  ;;  %v3473_v40 = vmul.f32 0.03125, %v3471_v7 }
 0xa80   : > { %v3475_v38 = vsub.f32 %v3461_v2, %v3473_v40  ;;  %v3476_v16 = vmul.f32 %v3474_v11, %v3474_v11 }
 0xa82   : > { %v3478_v19 = vsel %vm888_vm1, %v3476_v16, 0.0  ;;  %v3477_v44 = vmul.f32 %v3475_v38, %v3475_v38 }
 0xa83   : > { %3479 = vadd.xlane.f32.xlu0 %v3478_v19 }
 0xa84   : > { %v3481_v17 = vsel %vm888_vm1, %v3477_v44, 0.0 }
 0xa85   : > { %3482 = vadd.xlane.f32.xlu1 %v3481_v17 }
 0xb10   : > { %v3480_v24 = vpop.xlane.xlu0 %3479 }
 0xb11   : > { %v3484_v25 = vmul.f32 0.03125, %v3480_v24 }
 0xb12   : > { %v3483_v20 = vpop.xlane.xlu1 %3482 }
 0xb13   : > { %v3486_v31 = vadd.f32 1e-05, %v3484_v25  ;;  %v3485_v26 = vmul.f32 0.03125, %v3483_v20 }
 0xb15   : > { %4229 = vrsqrt.f32 %v3486_v31  ;;  %v3487_v27 = vadd.f32 1e-05, %v3485_v26 }
 0xb17   : > { %4231 = vrsqrt.f32 %v3487_v27 }
 0xb1f   : > { %v4230_v28 = vpop.eup %4229 }
 0xb20   : > { %v3490_v60 = vmul.f32 %v4230_v28, %v3474_v11 }
 0xb21   : > { %v4232_v23 = vpop.eup %4231 }
 0xb22   : > { %v3498_v42 = vmul.f32 %v3841_v32, %v3490_v60  ;;  %v3491_v35 = vmul.f32 %v4232_v23, %v3475_v38 }
 0xb24   : > { %v3499_v36 = vmul.f32 %v3841_v32, %v3491_v35  ;;  %v3506_v37 = vadd.f32 %v3842_v33, %v3498_v42 }
 0xb26   : > { %v3507_v14 = vadd.f32 %v3842_v33, %v3499_v36  ;;  %v3508_v12 = vadd.f32 %v3506_v37, %v5252_v50 }
 0xb28   : > { %v3509_v15 = vadd.f32 %v3507_v14, %v5254_v5  ;;  %3510 = vst.msk [vmem:[#allocation8] sm:$0xff] %vm888_vm1, %v3508_v12 }
 0xb2a   : > { %3511 = vst.msk [vmem:[#allocation8 + $0x8] sm:$0xff] %vm888_vm1, %v3509_v15 }
 0xb2b   : > { %4336 = shalt.err (!%p4333_p12)
}
 0xb2c   : > { %s5431_s22 = sld [smem:[#allocation35_spill]] }
 0xb32   : > { %s4337_s19 = scalar_lea.hbm %s5431_s22, 256 }
 0xb33   : > { %p4338_p8 = scmp.ne.s32.totalorder %s5431_s22, %s4337_s19  ;;  %p4343_p3 = scmp.lt.u32.totalorder %s4337_s19, %s5431_s22 }
 0xb35   : > { %p4339_p2 = pnand %p4338_p8, %p4091_p0 }
 0xb37   : > { %p4340_p11 = pneg %p4339_p2 }
 0xb39   : > { %p4345_p13 = pnand %p4343_p3, %p4340_p11 }
 0xb3b   : > { %4348 = shalt.err (!%p4345_p13)
}
 0xb3c   : > { %s4425_s21 = smov 128  }
 0xb3d   : > { %4074 = dma.vmem_to_hbm [thread:$0]  (%p4091_p0), %s3522_s30, 256, %s5431_s22, [#allocation4], %s4425_s21, %s4425_s21, %s4422_s26  }
 0xb3e   : > { %4382 = dma.done.wait (%p4091_p0), [#allocation4], 256  }
 0xb3f   : > { %4384 = vsyncadd (%p4091_p0), [#allocation4], 4294967040 }
 0xb40 PF: > { %s5432_s20 = sld [smem:[#allocation15_spill]]  ;;  %s5433_s24 = sld [smem:[#allocation12_spill]] }
 0xb41   : > { %s5434_s25 = sld [smem:[#allocation13_spill]]  ;;  %s5435_s26 = sld [smem:[#allocation17_spill]] }
 0xb42   : > { %s5436_s27 = sld [smem:[#allocation14_spill]]  ;;  %s5437_s28 = sld [smem:[#allocation16_spill]] }
 0xb46   : > { %s32_s29 = sadd.s32 1, %s5432_s20  }
 0xb47   : > { %p29_p5 = scmp.ge.s32.totalorder %s32_s29, 4  }
 0xb49   :  { %31 = sbr.rel (!%p29_p5) target bundleno = 21 (0x15), region = 189 }
 0xb50   :  { %3537 = vsyncpa [#allocation3], 1 }
 0xb51   :  { %3539 = vsyncpa [#allocation3 + $0x1], 1 }
 0xb52   :  { %3540 = vsyncpa [#allocation6], 1 }
 0xb53   :  { %3542 = vsyncpa [#allocation6 + $0x1], 1 }
 0xb54   :  { %3543 = vsyncpa [#allocation4], 1 }
 0xb55   :  { %3545 = vsyncpa [#allocation4 + $0x1], 1 }

</bundles_post_ra>
